<compile_context>
chip_gen: v5e
topology: v5e:2x2
jax: 0.10.0
libtpu: 0.0.40
codegen_flags: <defaults>
</compile_context>

<pallas_src>
import jax
import jax.numpy as jnp
from jax.experimental import pallas as pl
from jax.experimental.pallas import tpu as pltpu


def _make_fused_gat_kernel(layer_dims):
    """Build the fused multi-layer GAT kernel.

    layer_dims: static tuple of (din, fout, heads) per layer.
    Kernel args: (x_ref, adj_bias_ref,
                  w0, attn_lr0, b0, w1, attn_lr1, b1, ..., out_ref)
      w_i       (din_i, heads_i*fout_i)     bf16  fused multi-head projection
      attn_lr_i (heads_i*fout_i, 2*heads_i) bf16  block-diagonal attn weights:
                column 2h = attn_l of head h, column 2h+1 = attn_r of head h
      b_i       (1, heads_i*fout_i)         f32   output bias
    """
    n_layers = len(layer_dims)

    def kernel(x_ref, adjb_ref, *refs):
        out_ref = refs[-1]
        param_refs = refs[:-1]

        # Additive edge mask (0 on edges, -1e30 elsewhere). Read from HBM once
        # (bf16) and kept resident in VMEM as f32 for the whole network.
        adj_bias = adjb_ref[...].astype(jnp.float32)       # (N, N)
        h = x_ref[...]                                     # (N, in_feats) f32

        for li, (din, fout, heads) in enumerate(layer_dims):
            w = param_refs[3 * li + 0][...]                # (din, H*F)  bf16
            attn_lr = param_refs[3 * li + 1][...]          # (H*F, 2H)   bf16
            b = param_refs[3 * li + 2][...]                # (1, H*F)    f32

            # Fused multi-head projection (one MXU matmul, bf16 in / f32 acc).
            z = jnp.dot(h.astype(jnp.bfloat16), w,
                        preferred_element_type=jnp.float32)          # (N, H*F)
            z_bf = z.astype(jnp.bfloat16)                  # reused below

            # el/er for every head with ONE MXU matmul against the
            # block-diagonal attention weights.
            lr = jnp.dot(z_bf, attn_lr,
                         preferred_element_type=jnp.float32)         # (N, 2H)

            head_outs = []
            for hh in range(heads):
                s0 = hh * fout
                el = lr[:, 2 * hh:2 * hh + 1]              # (N, 1) src score
                er = lr[:, 2 * hh + 1:2 * hh + 2]          # (N, 1) dst score
                # e[dst, src] = leaky_relu(el[src] + er[dst], 0.2)
                e = er + jnp.transpose(el)                 # (N, N)
                e = jnp.maximum(e, 0.2 * e)
                scores = e + adj_bias                      # mask non-edges
                m = jnp.max(scores, axis=-1, keepdims=True)
                p = jnp.exp(scores - m)
                denom = jnp.sum(p, axis=-1, keepdims=True)
                alpha = p * pl.reciprocal(denom, approx=True)   # edge softmax
                # Weighted aggregation of projected src features (MXU) + bias.
                agg = jnp.dot(alpha.astype(jnp.bfloat16),
                              z_bf[:, s0:s0 + fout],
                              preferred_element_type=jnp.float32)    # (N, F)
                head_outs.append(agg + b[:, s0:s0 + fout])

            if li == n_layers - 1:
                # Final layer: mean over heads (1 head in the reference model).
                acc = head_outs[0]
                for t in head_outs[1:]:
                    acc = acc + t
                h = acc * (1.0 / heads)
            else:
                # flatten(1): heads are already contiguous on lanes.
                h = (head_outs[0] if heads == 1
                     else jnp.concatenate(head_outs, axis=-1))

        out_ref[...] = h.astype(out_ref.dtype)

    return kernel


@jax.jit
def gat_forward(x, adj, params):
    """Full GAT forward.

    x:      (N, in_feats)   node features (f32)
    adj:    (N, N)          dense adjacency, adj[dst, src] in {0, 1}
    params: list of layers, each (w (H,Din,F), attn_l (H,1,F),
            attn_r (H,1,F), bias (H,1,F))
    returns (N, n_classes)
    """
    N = x.shape[0]

    # Additive mask: 0 on edges, -1e30 elsewhere, shipped in bf16 (half the
    # HBM bytes). Self-loops guarantee a finite row max so masked entries
    # underflow to exactly 0 in the softmax.
    adj_bias = jnp.where(adj > 0, 0.0, -1e30).astype(jnp.bfloat16)

    flat_inputs = [x, adj_bias]
    in_specs = [
        pl.BlockSpec(x.shape, lambda i: (0, 0)),
        pl.BlockSpec(adj_bias.shape, lambda i: (0, 0)),
    ]

    layer_dims = []
    for (w, al, ar, b) in params:
        heads, din, fout = w.shape
        layer_dims.append((din, fout, heads))
        # Fuse heads onto lanes: column h*F + f of w_all is head h, feature f —
        # exactly the layout torch's fc + view + flatten(1) produces.
        w_all = jnp.transpose(w, (1, 0, 2)).reshape(din, heads * fout)
        w_all = w_all.astype(jnp.bfloat16)
        # Block-diagonal attention weights so one matmul yields el/er per head:
        # column 2h = attn_l of head h, column 2h+1 = attn_r of head h.
        eye = jnp.eye(heads, dtype=jnp.float32)
        al_cols = jnp.einsum('hf,hg->hfg', al[:, 0, :], eye)        # (H, F, H)
        ar_cols = jnp.einsum('hf,hg->hfg', ar[:, 0, :], eye)        # (H, F, H)
        attn_lr = jnp.stack([al_cols, ar_cols], axis=-1)            # (H, F, H, 2)
        attn_lr = attn_lr.reshape(heads * fout, 2 * heads).astype(jnp.bfloat16)
        b_all = b.reshape(1, heads * fout)
        for arr in (w_all, attn_lr, b_all):
            flat_inputs.append(arr)
            in_specs.append(pl.BlockSpec(arr.shape, lambda i: (0, 0)))

    _, last_fout, _ = layer_dims[-1]
    kernel = _make_fused_gat_kernel(tuple(layer_dims))

    out = pl.pallas_call(
        kernel,
        out_shape=jax.ShapeDtypeStruct((N, last_fout), jnp.float32),
        grid=(1,),
        in_specs=in_specs,
        out_specs=pl.BlockSpec((N, last_fout), lambda i: (0, 0)),
        compiler_params=pltpu.CompilerParams(
            dimension_semantics=("arbitrary",)),
    )(*flat_inputs)
    return out


def gat_reference(x, adj, params):
    """Pure-JAX f32 reference (dense DGL GATConv semantics)."""
    h = x
    n_layers = len(params)
    for li, (w, al, ar, b) in enumerate(params):
        heads = w.shape[0]
        outs = []
        for hh in range(heads):
            z = h @ w[hh]                                    # (N, F)
            el = jnp.sum(z * al[hh], axis=-1)                # (N,)
            er = jnp.sum(z * ar[hh], axis=-1)                # (N,)
            e = er[:, None] + el[None, :]                    # (N, N) [dst, src]
            e = jnp.where(e > 0, e, 0.2 * e)                 # leaky_relu(0.2)
            scores = jnp.where(adj > 0, e, -jnp.inf)
            alpha = jax.nn.softmax(scores, axis=-1)
            outs.append(alpha @ z + b[hh])
        if li == n_layers - 1:
            h = sum(outs) / heads
        else:
            h = jnp.concatenate(outs, axis=-1)
    return h


def init_gat_params(key, in_feats, n_hidden, n_classes, n_layers, num_heads):
    """Deterministic synthetic parameters matching the PyTorch module shapes."""
    params = []
    dims = [(in_feats, n_hidden, num_heads)]
    for _ in range(n_layers - 2):
        dims.append((n_hidden * num_heads, n_hidden, num_heads))
    dims.append((n_hidden * num_heads, n_classes, 1))

    for (din, dout, heads) in dims:
        key, k_w, k_al, k_ar, k_b = jax.random.split(key, 5)
        # fc.weight in torch is (heads*dout, din); stored here as (heads, din, dout).
        w = 0.1 * jax.random.normal(k_w, (heads, din, dout), jnp.float32)
        attn_l = 0.1 * jax.random.normal(k_al, (heads, 1, dout), jnp.float32)
        attn_r = 0.1 * jax.random.normal(k_ar, (heads, 1, dout), jnp.float32)
        bias = 0.1 * jax.random.normal(k_b, (heads, 1, dout), jnp.float32)
        params.append((w, attn_l, attn_r, bias))
    return params


if __name__ == "__main__":
    # Small, deterministic configuration consistent with the module.
    N = 64            # number of graph nodes
    in_feats = 16
    n_hidden = 8
    n_classes = 4
    n_layers = 3
    num_heads = 2

    key = jax.random.PRNGKey(0)
    k_x, k_adj, k_p = jax.random.split(key, 3)

    x = jax.random.normal(k_x, (N, in_feats), jnp.float32)

    # Random sparse-ish graph + self-loops (every node has in-degree >= 1,
    # as required by DGL GATConv with allow_zero_in_degree=False).
    adj = (jax.random.uniform(k_adj, (N, N)) < 0.1).astype(jnp.float32)
    adj = jnp.maximum(adj, jnp.eye(N, dtype=jnp.float32))

    params = init_gat_params(k_p, in_feats, n_hidden, n_classes,
                             n_layers, num_heads)

    out = gat_forward(x, adj, params)
    out = jax.block_until_ready(out)
    assert out.shape == (N, n_classes), out.shape
    assert jnp.all(jnp.isfinite(out))

    # Loose check against a pure-f32 JAX reference (kernel uses bf16 matmuls).
    ref = gat_reference(x, adj, params)
    assert jnp.max(jnp.abs(out - ref)) < 1e-1

    print("KERNEL_OK")
</pallas_src>

<mosaic_0001>
module attributes {stable_mosaic.version = 11 : i64} {
  func.func @kernel(%arg0: i32, %arg1: memref<64x16xf32, #tpu.memory_space<vmem>>, %arg2: memref<64x64xbf16, #tpu.memory_space<vmem>>, %arg3: memref<16x16xbf16, #tpu.memory_space<vmem>>, %arg4: memref<16x4xbf16, #tpu.memory_space<vmem>>, %arg5: memref<1x16xf32, #tpu.memory_space<vmem>>, %arg6: memref<16x16xbf16, #tpu.memory_space<vmem>>, %arg7: memref<16x4xbf16, #tpu.memory_space<vmem>>, %arg8: memref<1x16xf32, #tpu.memory_space<vmem>>, %arg9: memref<16x4xbf16, #tpu.memory_space<vmem>>, %arg10: memref<4x2xbf16, #tpu.memory_space<vmem>>, %arg11: memref<1x4xf32, #tpu.memory_space<vmem>>, %arg12: memref<64x4xf32, #tpu.memory_space<vmem>>) attributes {dimension_semantics = [#tpu.dimension_semantics<arbitrary>], iteration_bounds = array<i64: 1>, scalar_prefetch = 0 : i64, scratch_operands = 0 : i64, tpu.core_type = #tpu.core_type<tc>, window_params = [{pipeline_mode = #tpu.pipeline_mode<synchronous>, transform_indices = @transform_0, window_bounds = array<i64: 64, 16>}, {pipeline_mode = #tpu.pipeline_mode<synchronous>, transform_indices = @transform_1, window_bounds = array<i64: 64, 64>}, {pipeline_mode = #tpu.pipeline_mode<synchronous>, transform_indices = @transform_2, window_bounds = array<i64: 16, 16>}, {pipeline_mode = #tpu.pipeline_mode<synchronous>, transform_indices = @transform_3, window_bounds = array<i64: 16, 4>}, {pipeline_mode = #tpu.pipeline_mode<synchronous>, transform_indices = @transform_4, window_bounds = array<i64: 1, 16>}, {pipeline_mode = #tpu.pipeline_mode<synchronous>, transform_indices = @transform_5, window_bounds = array<i64: 16, 16>}, {pipeline_mode = #tpu.pipeline_mode<synchronous>, transform_indices = @transform_6, window_bounds = array<i64: 16, 4>}, {pipeline_mode = #tpu.pipeline_mode<synchronous>, transform_indices = @transform_7, window_bounds = array<i64: 1, 16>}, {pipeline_mode = #tpu.pipeline_mode<synchronous>, transform_indices = @transform_8, window_bounds = array<i64: 16, 4>}, {pipeline_mode = #tpu.pipeline_mode<synchronous>, transform_indices = @transform_9, window_bounds = array<i64: 4, 2>}, {pipeline_mode = #tpu.pipeline_mode<synchronous>, transform_indices = @transform_10, window_bounds = array<i64: 1, 4>}, {pipeline_mode = #tpu.pipeline_mode<synchronous>, transform_indices = @transform_11, window_bounds = array<i64: 64, 4>}]} {
    %c0 = arith.constant 0 : index
    %c0_0 = arith.constant 0 : index
    %0 = vector.load %arg2[%c0, %c0_0] : memref<64x64xbf16, #tpu.memory_space<vmem>>, vector<64x64xbf16>
    %1 = arith.extf %0 : vector<64x64xbf16> to vector<64x64xf32>
    %c0_1 = arith.constant 0 : index
    %c0_2 = arith.constant 0 : index
    %2 = vector.load %arg1[%c0_1, %c0_2] : memref<64x16xf32, #tpu.memory_space<vmem>>, vector<64x16xf32>
    %c0_3 = arith.constant 0 : index
    %c0_4 = arith.constant 0 : index
    %3 = vector.load %arg3[%c0_3, %c0_4] : memref<16x16xbf16, #tpu.memory_space<vmem>>, vector<16x16xbf16>
    %c0_5 = arith.constant 0 : index
    %c0_6 = arith.constant 0 : index
    %4 = vector.load %arg4[%c0_5, %c0_6] : memref<16x4xbf16, #tpu.memory_space<vmem>>, vector<16x4xbf16>
    %c0_7 = arith.constant 0 : index
    %c0_8 = arith.constant 0 : index
    %5 = vector.load %arg5[%c0_7, %c0_8] : memref<1x16xf32, #tpu.memory_space<vmem>>, vector<1x16xf32>
    %6 = arith.truncf %2 : vector<64x16xf32> to vector<64x16xbf16>
    %cst = arith.constant dense<0.000000e+00> : vector<64x16xf32>
    %7 = tpu.matmul %6, %3, %cst {dimension_numbers = #tpu.dot_dimension_numbers<[1], [0], [0], [1], [0, 0, 1, 1], [], []>} : vector<64x16xbf16>, vector<16x16xbf16>, vector<64x16xf32> -> vector<64x16xf32>
    %8 = arith.truncf %7 : vector<64x16xf32> to vector<64x16xbf16>
    %cst_9 = arith.constant dense<0.000000e+00> : vector<64x4xf32>
    %9 = tpu.matmul %8, %4, %cst_9 {dimension_numbers = #tpu.dot_dimension_numbers<[1], [0], [0], [1], [0, 0, 1, 1], [], []>} : vector<64x16xbf16>, vector<16x4xbf16>, vector<64x4xf32> -> vector<64x4xf32>
    %10 = vector.extract_strided_slice %9 {offsets = [0, 0], sizes = [64, 1], strides = [1, 1]} : vector<64x4xf32> to vector<64x1xf32>
    %11 = vector.extract_strided_slice %9 {offsets = [0, 1], sizes = [64, 1], strides = [1, 1]} : vector<64x4xf32> to vector<64x1xf32>
    %12 = tpu.transpose %10, [1, 0] : vector<64x1xf32> -> vector<1x64xf32>
    %13 = vector.broadcast %11 : vector<64x1xf32> to vector<64x64xf32>
    %14 = vector.broadcast %12 : vector<1x64xf32> to vector<64x64xf32>
    %15 = arith.addf %13, %14 : vector<64x64xf32>
    %cst_10 = arith.constant 2.000000e-01 : f32
    %16 = vector.broadcast %cst_10 : f32 to vector<64x64xf32>
    %17 = arith.mulf %16, %15 : vector<64x64xf32>
    %18 = arith.maximumf %15, %17 : vector<64x64xf32>
    %19 = arith.addf %18, %1 : vector<64x64xf32>
    %cst_11 = arith.constant dense<0xFF800000> : vector<64xf32>
    %20 = vector.multi_reduction <maximumf>, %19, %cst_11 [1] : vector<64x64xf32> to vector<64xf32>
    %21 = vector.shape_cast %20 : vector<64xf32> to vector<64x1xf32>
    %22 = vector.broadcast %21 : vector<64x1xf32> to vector<64x64xf32>
    %23 = arith.subf %19, %22 : vector<64x64xf32>
    %24 = math.exp %23 : vector<64x64xf32>
    %cst_12 = arith.constant dense<0.000000e+00> : vector<64xf32>
    %25 = vector.multi_reduction <add>, %24, %cst_12 [1] : vector<64x64xf32> to vector<64xf32>
    %26 = vector.shape_cast %25 : vector<64xf32> to vector<64x1xf32>
    %27 = tpu.reciprocal %26 {approx = true} : vector<64x1xf32> -> vector<64x1xf32>
    %28 = vector.broadcast %27 : vector<64x1xf32> to vector<64x64xf32>
    %29 = arith.mulf %24, %28 : vector<64x64xf32>
    %30 = arith.truncf %29 : vector<64x64xf32> to vector<64x64xbf16>
    %31 = vector.extract_strided_slice %8 {offsets = [0, 0], sizes = [64, 8], strides = [1, 1]} : vector<64x16xbf16> to vector<64x8xbf16>
    %cst_13 = arith.constant dense<0.000000e+00> : vector<64x8xf32>
    %32 = tpu.matmul %30, %31, %cst_13 {dimension_numbers = #tpu.dot_dimension_numbers<[1], [0], [0], [1], [0, 0, 1, 1], [], []>} : vector<64x64xbf16>, vector<64x8xbf16>, vector<64x8xf32> -> vector<64x8xf32>
    %33 = vector.extract_strided_slice %5 {offsets = [0, 0], sizes = [1, 8], strides = [1, 1]} : vector<1x16xf32> to vector<1x8xf32>
    %34 = vector.broadcast %33 : vector<1x8xf32> to vector<64x8xf32>
    %35 = arith.addf %32, %34 : vector<64x8xf32>
    %36 = vector.extract_strided_slice %9 {offsets = [0, 2], sizes = [64, 1], strides = [1, 1]} : vector<64x4xf32> to vector<64x1xf32>
    %37 = vector.extract_strided_slice %9 {offsets = [0, 3], sizes = [64, 1], strides = [1, 1]} : vector<64x4xf32> to vector<64x1xf32>
    %38 = tpu.transpose %36, [1, 0] : vector<64x1xf32> -> vector<1x64xf32>
    %39 = vector.broadcast %37 : vector<64x1xf32> to vector<64x64xf32>
    %40 = vector.broadcast %38 : vector<1x64xf32> to vector<64x64xf32>
    %41 = arith.addf %39, %40 : vector<64x64xf32>
    %cst_14 = arith.constant 2.000000e-01 : f32
    %42 = vector.broadcast %cst_14 : f32 to vector<64x64xf32>
    %43 = arith.mulf %42, %41 : vector<64x64xf32>
    %44 = arith.maximumf %41, %43 : vector<64x64xf32>
    %45 = arith.addf %44, %1 : vector<64x64xf32>
    %cst_15 = arith.constant dense<0xFF800000> : vector<64xf32>
    %46 = vector.multi_reduction <maximumf>, %45, %cst_15 [1] : vector<64x64xf32> to vector<64xf32>
    %47 = vector.shape_cast %46 : vector<64xf32> to vector<64x1xf32>
    %48 = vector.broadcast %47 : vector<64x1xf32> to vector<64x64xf32>
    %49 = arith.subf %45, %48 : vector<64x64xf32>
    %50 = math.exp %49 : vector<64x64xf32>
    %cst_16 = arith.constant dense<0.000000e+00> : vector<64xf32>
    %51 = vector.multi_reduction <add>, %50, %cst_16 [1] : vector<64x64xf32> to vector<64xf32>
    %52 = vector.shape_cast %51 : vector<64xf32> to vector<64x1xf32>
    %53 = tpu.reciprocal %52 {approx = true} : vector<64x1xf32> -> vector<64x1xf32>
    %54 = vector.broadcast %53 : vector<64x1xf32> to vector<64x64xf32>
    %55 = arith.mulf %50, %54 : vector<64x64xf32>
    %56 = arith.truncf %55 : vector<64x64xf32> to vector<64x64xbf16>
    %57 = vector.extract_strided_slice %8 {offsets = [0, 8], sizes = [64, 8], strides = [1, 1]} : vector<64x16xbf16> to vector<64x8xbf16>
    %cst_17 = arith.constant dense<0.000000e+00> : vector<64x8xf32>
    %58 = tpu.matmul %56, %57, %cst_17 {dimension_numbers = #tpu.dot_dimension_numbers<[1], [0], [0], [1], [0, 0, 1, 1], [], []>} : vector<64x64xbf16>, vector<64x8xbf16>, vector<64x8xf32> -> vector<64x8xf32>
    %59 = vector.extract_strided_slice %5 {offsets = [0, 8], sizes = [1, 8], strides = [1, 1]} : vector<1x16xf32> to vector<1x8xf32>
    %60 = vector.broadcast %59 : vector<1x8xf32> to vector<64x8xf32>
    %61 = arith.addf %58, %60 : vector<64x8xf32>
    %62 = tpu.concatenate %35, %61 in 1 : vector<64x8xf32>, vector<64x8xf32> -> vector<64x16xf32>
    %c0_18 = arith.constant 0 : index
    %c0_19 = arith.constant 0 : index
    %63 = vector.load %arg6[%c0_18, %c0_19] : memref<16x16xbf16, #tpu.memory_space<vmem>>, vector<16x16xbf16>
    %c0_20 = arith.constant 0 : index
    %c0_21 = arith.constant 0 : index
    %64 = vector.load %arg7[%c0_20, %c0_21] : memref<16x4xbf16, #tpu.memory_space<vmem>>, vector<16x4xbf16>
    %c0_22 = arith.constant 0 : index
    %c0_23 = arith.constant 0 : index
    %65 = vector.load %arg8[%c0_22, %c0_23] : memref<1x16xf32, #tpu.memory_space<vmem>>, vector<1x16xf32>
    %66 = arith.truncf %62 : vector<64x16xf32> to vector<64x16xbf16>
    %cst_24 = arith.constant dense<0.000000e+00> : vector<64x16xf32>
    %67 = tpu.matmul %66, %63, %cst_24 {dimension_numbers = #tpu.dot_dimension_numbers<[1], [0], [0], [1], [0, 0, 1, 1], [], []>} : vector<64x16xbf16>, vector<16x16xbf16>, vector<64x16xf32> -> vector<64x16xf32>
    %68 = arith.truncf %67 : vector<64x16xf32> to vector<64x16xbf16>
    %cst_25 = arith.constant dense<0.000000e+00> : vector<64x4xf32>
    %69 = tpu.matmul %68, %64, %cst_25 {dimension_numbers = #tpu.dot_dimension_numbers<[1], [0], [0], [1], [0, 0, 1, 1], [], []>} : vector<64x16xbf16>, vector<16x4xbf16>, vector<64x4xf32> -> vector<64x4xf32>
    %70 = vector.extract_strided_slice %69 {offsets = [0, 0], sizes = [64, 1], strides = [1, 1]} : vector<64x4xf32> to vector<64x1xf32>
    %71 = vector.extract_strided_slice %69 {offsets = [0, 1], sizes = [64, 1], strides = [1, 1]} : vector<64x4xf32> to vector<64x1xf32>
    %72 = tpu.transpose %70, [1, 0] : vector<64x1xf32> -> vector<1x64xf32>
    %73 = vector.broadcast %71 : vector<64x1xf32> to vector<64x64xf32>
    %74 = vector.broadcast %72 : vector<1x64xf32> to vector<64x64xf32>
    %75 = arith.addf %73, %74 : vector<64x64xf32>
    %cst_26 = arith.constant 2.000000e-01 : f32
    %76 = vector.broadcast %cst_26 : f32 to vector<64x64xf32>
    %77 = arith.mulf %76, %75 : vector<64x64xf32>
    %78 = arith.maximumf %75, %77 : vector<64x64xf32>
    %79 = arith.addf %78, %1 : vector<64x64xf32>
    %cst_27 = arith.constant dense<0xFF800000> : vector<64xf32>
    %80 = vector.multi_reduction <maximumf>, %79, %cst_27 [1] : vector<64x64xf32> to vector<64xf32>
    %81 = vector.shape_cast %80 : vector<64xf32> to vector<64x1xf32>
    %82 = vector.broadcast %81 : vector<64x1xf32> to vector<64x64xf32>
    %83 = arith.subf %79, %82 : vector<64x64xf32>
    %84 = math.exp %83 : vector<64x64xf32>
    %cst_28 = arith.constant dense<0.000000e+00> : vector<64xf32>
    %85 = vector.multi_reduction <add>, %84, %cst_28 [1] : vector<64x64xf32> to vector<64xf32>
    %86 = vector.shape_cast %85 : vector<64xf32> to vector<64x1xf32>
    %87 = tpu.reciprocal %86 {approx = true} : vector<64x1xf32> -> vector<64x1xf32>
    %88 = vector.broadcast %87 : vector<64x1xf32> to vector<64x64xf32>
    %89 = arith.mulf %84, %88 : vector<64x64xf32>
    %90 = arith.truncf %89 : vector<64x64xf32> to vector<64x64xbf16>
    %91 = vector.extract_strided_slice %68 {offsets = [0, 0], sizes = [64, 8], strides = [1, 1]} : vector<64x16xbf16> to vector<64x8xbf16>
    %cst_29 = arith.constant dense<0.000000e+00> : vector<64x8xf32>
    %92 = tpu.matmul %90, %91, %cst_29 {dimension_numbers = #tpu.dot_dimension_numbers<[1], [0], [0], [1], [0, 0, 1, 1], [], []>} : vector<64x64xbf16>, vector<64x8xbf16>, vector<64x8xf32> -> vector<64x8xf32>
    %93 = vector.extract_strided_slice %65 {offsets = [0, 0], sizes = [1, 8], strides = [1, 1]} : vector<1x16xf32> to vector<1x8xf32>
    %94 = vector.broadcast %93 : vector<1x8xf32> to vector<64x8xf32>
    %95 = arith.addf %92, %94 : vector<64x8xf32>
    %96 = vector.extract_strided_slice %69 {offsets = [0, 2], sizes = [64, 1], strides = [1, 1]} : vector<64x4xf32> to vector<64x1xf32>
    %97 = vector.extract_strided_slice %69 {offsets = [0, 3], sizes = [64, 1], strides = [1, 1]} : vector<64x4xf32> to vector<64x1xf32>
    %98 = tpu.transpose %96, [1, 0] : vector<64x1xf32> -> vector<1x64xf32>
    %99 = vector.broadcast %97 : vector<64x1xf32> to vector<64x64xf32>
    %100 = vector.broadcast %98 : vector<1x64xf32> to vector<64x64xf32>
    %101 = arith.addf %99, %100 : vector<64x64xf32>
    %cst_30 = arith.constant 2.000000e-01 : f32
    %102 = vector.broadcast %cst_30 : f32 to vector<64x64xf32>
    %103 = arith.mulf %102, %101 : vector<64x64xf32>
    %104 = arith.maximumf %101, %103 : vector<64x64xf32>
    %105 = arith.addf %104, %1 : vector<64x64xf32>
    %cst_31 = arith.constant dense<0xFF800000> : vector<64xf32>
    %106 = vector.multi_reduction <maximumf>, %105, %cst_31 [1] : vector<64x64xf32> to vector<64xf32>
    %107 = vector.shape_cast %106 : vector<64xf32> to vector<64x1xf32>
    %108 = vector.broadcast %107 : vector<64x1xf32> to vector<64x64xf32>
    %109 = arith.subf %105, %108 : vector<64x64xf32>
    %110 = math.exp %109 : vector<64x64xf32>
    %cst_32 = arith.constant dense<0.000000e+00> : vector<64xf32>
    %111 = vector.multi_reduction <add>, %110, %cst_32 [1] : vector<64x64xf32> to vector<64xf32>
    %112 = vector.shape_cast %111 : vector<64xf32> to vector<64x1xf32>
    %113 = tpu.reciprocal %112 {approx = true} : vector<64x1xf32> -> vector<64x1xf32>
    %114 = vector.broadcast %113 : vector<64x1xf32> to vector<64x64xf32>
    %115 = arith.mulf %110, %114 : vector<64x64xf32>
    %116 = arith.truncf %115 : vector<64x64xf32> to vector<64x64xbf16>
    %117 = vector.extract_strided_slice %68 {offsets = [0, 8], sizes = [64, 8], strides = [1, 1]} : vector<64x16xbf16> to vector<64x8xbf16>
    %cst_33 = arith.constant dense<0.000000e+00> : vector<64x8xf32>
    %118 = tpu.matmul %116, %117, %cst_33 {dimension_numbers = #tpu.dot_dimension_numbers<[1], [0], [0], [1], [0, 0, 1, 1], [], []>} : vector<64x64xbf16>, vector<64x8xbf16>, vector<64x8xf32> -> vector<64x8xf32>
    %119 = vector.extract_strided_slice %65 {offsets = [0, 8], sizes = [1, 8], strides = [1, 1]} : vector<1x16xf32> to vector<1x8xf32>
    %120 = vector.broadcast %119 : vector<1x8xf32> to vector<64x8xf32>
    %121 = arith.addf %118, %120 : vector<64x8xf32>
    %122 = tpu.concatenate %95, %121 in 1 : vector<64x8xf32>, vector<64x8xf32> -> vector<64x16xf32>
    %c0_34 = arith.constant 0 : index
    %c0_35 = arith.constant 0 : index
    %123 = vector.load %arg9[%c0_34, %c0_35] : memref<16x4xbf16, #tpu.memory_space<vmem>>, vector<16x4xbf16>
    %c0_36 = arith.constant 0 : index
    %c0_37 = arith.constant 0 : index
    %124 = vector.load %arg10[%c0_36, %c0_37] : memref<4x2xbf16, #tpu.memory_space<vmem>>, vector<4x2xbf16>
    %c0_38 = arith.constant 0 : index
    %c0_39 = arith.constant 0 : index
    %125 = vector.load %arg11[%c0_38, %c0_39] : memref<1x4xf32, #tpu.memory_space<vmem>>, vector<1x4xf32>
    %126 = arith.truncf %122 : vector<64x16xf32> to vector<64x16xbf16>
    %cst_40 = arith.constant dense<0.000000e+00> : vector<64x4xf32>
    %127 = tpu.matmul %126, %123, %cst_40 {dimension_numbers = #tpu.dot_dimension_numbers<[1], [0], [0], [1], [0, 0, 1, 1], [], []>} : vector<64x16xbf16>, vector<16x4xbf16>, vector<64x4xf32> -> vector<64x4xf32>
    %128 = arith.truncf %127 : vector<64x4xf32> to vector<64x4xbf16>
    %cst_41 = arith.constant dense<0.000000e+00> : vector<64x2xf32>
    %129 = tpu.matmul %128, %124, %cst_41 {dimension_numbers = #tpu.dot_dimension_numbers<[1], [0], [0], [1], [0, 0, 1, 1], [], []>} : vector<64x4xbf16>, vector<4x2xbf16>, vector<64x2xf32> -> vector<64x2xf32>
    %130 = vector.extract_strided_slice %129 {offsets = [0, 0], sizes = [64, 1], strides = [1, 1]} : vector<64x2xf32> to vector<64x1xf32>
    %131 = vector.extract_strided_slice %129 {offsets = [0, 1], sizes = [64, 1], strides = [1, 1]} : vector<64x2xf32> to vector<64x1xf32>
    %132 = tpu.transpose %130, [1, 0] : vector<64x1xf32> -> vector<1x64xf32>
    %133 = vector.broadcast %131 : vector<64x1xf32> to vector<64x64xf32>
    %134 = vector.broadcast %132 : vector<1x64xf32> to vector<64x64xf32>
    %135 = arith.addf %133, %134 : vector<64x64xf32>
    %cst_42 = arith.constant 2.000000e-01 : f32
    %136 = vector.broadcast %cst_42 : f32 to vector<64x64xf32>
    %137 = arith.mulf %136, %135 : vector<64x64xf32>
    %138 = arith.maximumf %135, %137 : vector<64x64xf32>
    %139 = arith.addf %138, %1 : vector<64x64xf32>
    %cst_43 = arith.constant dense<0xFF800000> : vector<64xf32>
    %140 = vector.multi_reduction <maximumf>, %139, %cst_43 [1] : vector<64x64xf32> to vector<64xf32>
    %141 = vector.shape_cast %140 : vector<64xf32> to vector<64x1xf32>
    %142 = vector.broadcast %141 : vector<64x1xf32> to vector<64x64xf32>
    %143 = arith.subf %139, %142 : vector<64x64xf32>
    %144 = math.exp %143 : vector<64x64xf32>
    %cst_44 = arith.constant dense<0.000000e+00> : vector<64xf32>
    %145 = vector.multi_reduction <add>, %144, %cst_44 [1] : vector<64x64xf32> to vector<64xf32>
    %146 = vector.shape_cast %145 : vector<64xf32> to vector<64x1xf32>
    %147 = tpu.reciprocal %146 {approx = true} : vector<64x1xf32> -> vector<64x1xf32>
    %148 = vector.broadcast %147 : vector<64x1xf32> to vector<64x64xf32>
    %149 = arith.mulf %144, %148 : vector<64x64xf32>
    %150 = arith.truncf %149 : vector<64x64xf32> to vector<64x64xbf16>
    %cst_45 = arith.constant dense<0.000000e+00> : vector<64x4xf32>
    %151 = tpu.matmul %150, %128, %cst_45 {dimension_numbers = #tpu.dot_dimension_numbers<[1], [0], [0], [1], [0, 0, 1, 1], [], []>} : vector<64x64xbf16>, vector<64x4xbf16>, vector<64x4xf32> -> vector<64x4xf32>
    %152 = vector.broadcast %125 : vector<1x4xf32> to vector<64x4xf32>
    %153 = arith.addf %151, %152 : vector<64x4xf32>
    %cst_46 = arith.constant 1.000000e+00 : f32
    %154 = vector.broadcast %cst_46 : f32 to vector<64x4xf32>
    %155 = arith.mulf %153, %154 : vector<64x4xf32>
    %c0_47 = arith.constant 0 : index
    %c0_48 = arith.constant 0 : index
    %156 = vector.load %arg12[%c0_47, %c0_48] : memref<64x4xf32, #tpu.memory_space<vmem>>, vector<64x4xf32>
    tpu.vector_store %arg12[%c0_47, %c0_48], %155 {strides = array<i32>} : memref<64x4xf32, #tpu.memory_space<vmem>>, vector<64x4xf32>,
    return
  }
  func.func @transform_0(%arg0: i32) -> (i32, i32) {
    %c0_i32 = arith.constant 0 : i32
    %c0_i32_0 = arith.constant 0 : i32
    %c0_i32_1 = arith.constant 0 : i32
    return %c0_i32, %c0_i32_0 : i32, i32
  }
  func.func @transform_1(%arg0: i32) -> (i32, i32) {
    %c0_i32 = arith.constant 0 : i32
    %c0_i32_0 = arith.constant 0 : i32
    %c0_i32_1 = arith.constant 0 : i32
    return %c0_i32, %c0_i32_0 : i32, i32
  }
  func.func @transform_2(%arg0: i32) -> (i32, i32) {
    %c0_i32 = arith.constant 0 : i32
    %c0_i32_0 = arith.constant 0 : i32
    %c0_i32_1 = arith.constant 0 : i32
    return %c0_i32, %c0_i32_0 : i32, i32
  }
  func.func @transform_3(%arg0: i32) -> (i32, i32) {
    %c0_i32 = arith.constant 0 : i32
    %c0_i32_0 = arith.constant 0 : i32
    %c0_i32_1 = arith.constant 0 : i32
    return %c0_i32, %c0_i32_0 : i32, i32
  }
  func.func @transform_4(%arg0: i32) -> (i32, i32) {
    %c0_i32 = arith.constant 0 : i32
    %c0_i32_0 = arith.constant 0 : i32
    %c0_i32_1 = arith.constant 0 : i32
    return %c0_i32, %c0_i32_0 : i32, i32
  }
  func.func @transform_5(%arg0: i32) -> (i32, i32) {
    %c0_i32 = arith.constant 0 : i32
    %c0_i32_0 = arith.constant 0 : i32
    %c0_i32_1 = arith.constant 0 : i32
    return %c0_i32, %c0_i32_0 : i32, i32
  }
  func.func @transform_6(%arg0: i32) -> (i32, i32) {
    %c0_i32 = arith.constant 0 : i32
    %c0_i32_0 = arith.constant 0 : i32
    %c0_i32_1 = arith.constant 0 : i32
    return %c0_i32, %c0_i32_0 : i32, i32
  }
  func.func @transform_7(%arg0: i32) -> (i32, i32) {
    %c0_i32 = arith.constant 0 : i32
    %c0_i32_0 = arith.constant 0 : i32
    %c0_i32_1 = arith.constant 0 : i32
    return %c0_i32, %c0_i32_0 : i32, i32
  }
  func.func @transform_8(%arg0: i32) -> (i32, i32) {
    %c0_i32 = arith.constant 0 : i32
    %c0_i32_0 = arith.constant 0 : i32
    %c0_i32_1 = arith.constant 0 : i32
    return %c0_i32, %c0_i32_0 : i32, i32
  }
  func.func @transform_9(%arg0: i32) -> (i32, i32) {
    %c0_i32 = arith.constant 0 : i32
    %c0_i32_0 = arith.constant 0 : i32
    %c0_i32_1 = arith.constant 0 : i32
    return %c0_i32, %c0_i32_0 : i32, i32
  }
  func.func @transform_10(%arg0: i32) -> (i32, i32) {
    %c0_i32 = arith.constant 0 : i32
    %c0_i32_0 = arith.constant 0 : i32
    %c0_i32_1 = arith.constant 0 : i32
    return %c0_i32, %c0_i32_0 : i32, i32
  }
  func.func @transform_11(%arg0: i32) -> (i32, i32) {
    %c0_i32 = arith.constant 0 : i32
    %c0_i32_0 = arith.constant 0 : i32
    %c0_i32_1 = arith.constant 0 : i32
    return %c0_i32, %c0_i32_0 : i32, i32
  }
}

</mosaic_0001>

<bundles_post_ra>
// kernel: gat_forward.1
= control target key start
LH: loop header
LB: loop body
LE: loop exit
PB: predicated region body
PF: predicated region fallthrough
CT: control target
= control target key end

     0   :  { %vm78_vm0 = vcmask 130048   ;;  %v2119_v34 = vmov 3   ;;  %v2120_v43 = vmov 1   ;;  %vm300_vm1 = vcmask 523264   ;;  %s2937_s2 = inlined_call_operand.vmem [shape: bf16[16,16], index: 2, kind: input, shape index: {}]   ;;  %s2938_s0 = inlined_call_operand.vmem [shape: f32[64,16], index: 0, kind: input, shape index: {}]   ;;  %s2939_s3 = inlined_call_operand.vmem [shape: bf16[16,4], index: 3, kind: input, shape index: {}]   ;;  %s2940_s1 = inlined_call_operand.vmem [shape: bf16[64,64], index: 1, kind: input, shape index: {}]   ;;  %s2941_s4 = inlined_call_operand.vmem [shape: f32[1,16], index: 4, kind: input, shape index: {}]   ;;  %s2942_s5 = inlined_call_operand.vmem [shape: bf16[16,16], index: 5, kind: input, shape index: {}]   ;;  %s2943_s6 = inlined_call_operand.vmem [shape: bf16[16,4], index: 6, kind: input, shape index: {}]   ;;  %s2944_s7 = inlined_call_operand.vmem [shape: f32[1,16], index: 7, kind: input, shape index: {}]   ;;  %s2945_s8 = inlined_call_operand.vmem [shape: bf16[16,4], index: 8, kind: input, shape index: {}]   ;;  %s2946_s9 = inlined_call_operand.vmem [shape: bf16[4,2], index: 9, kind: input, shape index: {}]   ;;  %s2947_s10 = inlined_call_operand.vmem [shape: f32[1,4], index: 10, kind: input, shape index: {}]   ;;  %s2948_s11 = inlined_call_operand.vmem [shape: f32[64,4], index: 11, kind: output, shape index: {}]  }
   0x1   :  { %v1858_v0 = vld [vmem:[%s2937_s2] sm:$0xff]  ;;  %v56_v2 = vld [vmem:[%s2938_s0 + $0x8] sm:$0xff]  ;;  %v57_v4 = vld [vmem:[%s2938_s0 + $0x10] sm:$0xff]  ;;  %1892 = vset.pattern.permute.xlu0 %v2119_v34  ;;  %1893 = vset.pattern.permute.xlu1 %v2120_v43  ;;  %vm742_vm2 = vcmask 64512   ;;  %vm1508_vm3 = vcmask 1041408   ;;  %vm1495_vm4 = vcmask 31744  }
   0x2   :  { %v55_v1 = vld [vmem:[%s2938_s0] sm:$0xff]  ;;  %98 = vmatpush.bf16.msra.mxu0 %v1858_v0  ;;  %v58_v5 = vld [vmem:[%s2938_s0 + $0x18] sm:$0xff]  ;;  %v60_v8 = vld [vmem:[%s2938_s0 + $0x28] sm:$0xff]  ;;  %1900 = vset.pattern.permute.xlu2 %v2120_v43 }
   0x3   :  { %v68_v3 = vpack.c.bf16 %v56_v2, %v55_v1  ;;  %v69_v6 = vpack.c.bf16 %v58_v5, %v57_v4  ;;  %v59_v7 = vld [vmem:[%s2938_s0 + $0x20] sm:$0xff]  ;;  %v61_v10 = vld [vmem:[%s2938_s0 + $0x30] sm:$0xff]  ;;  %v62_v11 = vld [vmem:[%s2938_s0 + $0x38] sm:$0xff]  ;;  %s2121_s0 = smov 126  }
   0x4   :  { %v70_v9 = vpack.c.bf16 %v60_v8, %v59_v7  ;;  %v71_v12 = vpack.c.bf16 %v62_v11, %v61_v10  ;;  %v1859_v13 = vld [vmem:[%s2939_s3] sm:$0xff]  ;;  %v1879_v10 = vld [vmem:[%s2940_s1 + $0x8] sm:$0xff]  }
   0x5   :  { %1798 = vmatmul.msk.bf16.vlgmr.msra.gmra.mxu0 %vm78_vm0, %v68_v3  ;;  %173 = vmatpush.bf16.msra.mxu1 %v1859_v13  ;;  %v1880_v13 = vld [vmem:[%s2940_s1 + $0x10] sm:$0xff]  }
  0x15   :  { %1799 = vmatmul.msk.bf16.gmra.mxu0 %vm78_vm0, %v69_v6 }
  0x25   :  { %1800 = vmatmul.msk.bf16.gmra.mxu0 %vm78_vm0, %v70_v9 }
  0x35   :  { %1801 = vmatmul.msk.bf16.gmra.mxu0 %vm78_vm0, %v71_v12 }
  0x82   :  { %v100_v14 = vpop.f32.mrf.mxu0 }
  0x83   :  { %v120_v15 = vpack.c.bf16 %v100_v14, %v100_v14 }
  0x85   :  { %v136_v18 = vunpack.c.l.b16 %v120_v15 }
  0x8a   :  { %v102_v16 = vpop.f32.mrf.mxu0 }
  0x8b   :  { %v121_v17 = vpack.c.bf16 %v102_v16, %v102_v16  ;;  %v2310_v16 = vunpack.c.h.bf16 %v1879_v10 }
  0x8d   :  { %v137_v19 = vunpack.c.l.b16 %v121_v17 }
  0x8f   :  { %v2218_v20 = vpack.c.b16 %v137_v19, %v136_v18  ;;  %v2312_v19 = vunpack.c.l.bf16 %v1879_v10 }
  0x91   :  { %1806 = vmatmul.msk.bf16.vlgmr.msra.gmra.mxu1 %vm78_vm0, %v2218_v20 }
  0x92   :  { %v105_v21 = vpop.f32.mrf.mxu0 }
  0x93   :  { %v122_v22 = vpack.c.bf16 %v105_v21, %v105_v21 }
  0x95   :  { %v138_v25 = vunpack.c.l.b16 %v122_v22 }
  0x9a   :  { %v107_v23 = vpop.f32.mrf.mxu0 }
  0x9b   :  { %v123_v24 = vpack.c.bf16 %v107_v23, %v107_v23 }
  0x9d   :  { %v139_v26 = vunpack.c.l.b16 %v123_v24 }
  0x9f   :  { %v2222_v27 = vpack.c.b16 %v139_v26, %v138_v25  ;;  %v2314_v25 = vunpack.c.l.bf16 %v1880_v13 }
  0xa1   :  { %1807 = vmatmul.msk.bf16.gmra.mxu1 %vm78_vm0, %v2222_v27 }
  0xa2   :  { %v110_v28 = vpop.f32.mrf.mxu0 }
  0xa3   :  { %v124_v29 = vpack.c.bf16 %v110_v28, %v110_v28 }
  0xa5   :  { %v140_v32 = vunpack.c.l.b16 %v124_v29 }
  0xaa   :  { %v112_v30 = vpop.f32.mrf.mxu0 }
  0xab   :  { %v125_v31 = vpack.c.bf16 %v112_v30, %v112_v30 }
  0xad   :  { %v141_v33 = vunpack.c.l.b16 %v125_v31 }
  0xaf   :  { %v2227_v35 = vpack.c.b16 %v141_v33, %v140_v32 }
  0xb1   :  { %1808 = vmatmul.msk.bf16.gmra.mxu1 %vm78_vm0, %v2227_v35 }
  0xb2   :  { %v115_v36 = vpop.f32.mrf.mxu0 }
  0xb3   :  { %v126_v37 = vpack.c.bf16 %v115_v36, %v115_v36  ;;  %v2324_v36 = vunpack.c.h.bf16 %v1880_v13 }
  0xb5   :  { %v142_v39 = vunpack.c.l.b16 %v126_v37 }
  0xba   :  { %v117_v38 = vpop.f32.mrf.mxu0 }
  0xbb   :  { %v127_v40 = vpack.c.bf16 %v117_v38, %v117_v38 }
  0xbd   :  { %v143_v41 = vunpack.c.l.b16 %v127_v40  ;;  %v1864_v40 = vld [vmem:[%s2940_s1] sm:$0xff]  }
  0xbf   :  { %v2231_v42 = vpack.c.b16 %v143_v41, %v142_v39 }
  0xc1   :  { %416 = vmatpush.bf16.msra.mxu2 %v2231_v42  ;;  %1882 = vmatpush.bf16.msra.mxu3 %v2231_v42 }
  0xc2   :  { %1809 = vmatmul.msk.bf16.gmra.mxu1 %vm78_vm0, %v2231_v42 }
  0xc5   :  { %417 = vmatpush.bf16.msra.mxu2 %v2227_v35  ;;  %1883 = vmatpush.bf16.msra.mxu3 %v2227_v35 }
  0xc9   :  { %418 = vmatpush.bf16.msra.mxu2 %v2222_v27  ;;  %1884 = vmatpush.bf16.msra.mxu3 %v2222_v27 }
  0xcd   :  { %419 = vmatpush.bf16.msra.mxu2 %v2218_v20  ;;  %1885 = vmatpush.bf16.msra.mxu3 %v2218_v20 }
 0x10e   :  { %v175_v44 = vpop.f32.mrf.mxu1 }
 0x10f   :  { %498 = vperm.xlu0 %1892, %v175_v44   ;;  %441 = vrot.lane.b32.xlu1 %v175_v44, %s2121_s0 }
 0x116   :  { %v177_v45 = vpop.f32.mrf.mxu1 }
 0x117   :  { %229 = vperm.xlu1 %1893, %v175_v44   ;;  %1896 = vset.pattern.permute.xlu0 %v2120_v43 }
 0x11e   :  { %v180_v46 = vpop.f32.mrf.mxu1 }
 0x11f   :  { %443 = vrot.lane.b32.xlu1 %v177_v45, %s2121_s0  ;;  %445 = vrot.lane.b32.xlu2 %v180_v46, %s2121_s0 }
 0x120   :  { %239 = vperm.xlu0 %1896, %v180_v46   ;;  %1894 = vset.pattern.permute.xlu1 %v2119_v34 }
 0x126   :  { %v182_v47 = vpop.f32.mrf.mxu1 }
 0x127   :  { %502 = vperm.xlu1 %1894, %v177_v45  }
 0x128   :  { %1897 = vset.pattern.permute.xlu0 %v2119_v34 }
 0x129   :  { %506 = vperm.xlu0 %1897, %v180_v46  }
 0x12e   :  { %v185_v48 = vpop.f32.mrf.mxu1 }
 0x12f   :  { %1895 = vset.pattern.permute.xlu1 %v2120_v43  ;;  %249 = vperm.xlu2 %1900, %v185_v48  }
 0x130   :  { %234 = vperm.xlu1 %1895, %v177_v45  }
 0x131   :  { %1898 = vset.pattern.permute.xlu0 %v2120_v43 }
 0x132   :  { %244 = vperm.xlu0 %1898, %v182_v47  }
 0x136   :  { %v187_v49 = vpop.f32.mrf.mxu1 }
 0x138   :  { %447 = vrot.lane.b32.xlu1 %v182_v47, %s2121_s0 }
 0x139   :  { %1901 = vset.pattern.permute.xlu1 %v2119_v34 }
 0x13a   :  { %1899 = vset.pattern.permute.xlu0 %v2119_v34 }
 0x13b   :  { %510 = vperm.xlu0 %1899, %v182_v47  }
 0x13f   :  { %v190_v50 = vpop.f32.mrf.mxu1 }
 0x140   :  { %514 = vperm.xlu1 %1901, %v185_v48  }
 0x143   :  { %449 = vrot.lane.b32.xlu0 %v185_v48, %s2121_s0 }
 0x144   :  { %1902 = vset.pattern.permute.xlu0 %v2120_v43 }
 0x147   :  { %v2260_v51 = vpop.f32.mrf.mxu1 }
 0x148   :  { %451 = vrot.lane.b32.xlu1 %v187_v49, %s2121_s0 }
 0x14b   :  { %254 = vperm.xlu0 %1902, %v187_v49  }
 0x150   :  { %518 = vperm.xlu1 %1901, %v187_v49  }
 0x153   :  { %453 = vrot.lane.b32.xlu0 %v190_v50, %s2121_s0 }
 0x155   :  { %195 = vxpose.xlu2.b32.start [1/8] (short) (narrow) %v175_v44, 8 }
 0x158   :  { %522 = vperm.xlu1 %1901, %v190_v50  }
 0x15b   :  { %259 = vperm.xlu0 %1902, %v190_v50  }
 0x15d   :  { %196 = vxpose.xlu2.b32.cont [2/8] (short) (narrow) %v177_v45, 8  ;;  %v2336_v45 = vunpack.c.l.bf16 %v1864_v40 }
 0x160   :  { %455 = vrot.lane.b32.xlu1 %v2260_v51, %s2121_s0 }
 0x161   :  { %1903 = vset.pattern.permute.xlu1 %v2120_v43 }
 0x165   :  { %197 = vxpose.xlu2.b32.cont [3/8] (short) (narrow) %v180_v46, 8 }
 0x168   :  { %264 = vperm.xlu1 %1903, %v2260_v51  }
 0x16d   :  { %198 = vxpose.xlu2.b32.cont [4/8] (short) (narrow) %v182_v47, 8 }
 0x175   :  { %199 = vxpose.xlu2.b32.cont [5/8] (short) (narrow) %v185_v48, 8 }
 0x179   :  { %v2289_v2 = vpop.permute.xlu2 %445 }
 0x17d   :  { %200 = vxpose.xlu2.b32.cont [6/8] (short) (narrow) %v187_v49, 8 }
 0x181   :  { %v2267_v52 = vpop.permute.xlu1 %441  ;;  %v2271_v55 = vpop.permute.xlu0 %498 }
 0x185   :  { %201 = vxpose.xlu2.b32.cont [7/8] (short) (narrow) %v190_v50, 8  ;;  %v1881_v50 = vld [vmem:[%s2940_s1 + $0x18] sm:$0xff]   ;;  %s2122_s1 = smov 120  }
 0x189   :  { %v230_v53 = vpop.permute.xlu1 %229  ;;  %v250_v5 = vpop.permute.xlu2 %249 }
 0x18d   :  { %202 = vxpose.xlu2.b32.end [8/8] (short) (narrow) %v2260_v51, 8 }
 0x191   :  { %v2269_v54 = vpop.permute.xlu1 %443 }
 0x192   :  { %v240_v57 = vpop.permute.xlu0 %239 }
 0x199   :  { %v2273_v56 = vpop.permute.xlu1 %502 }
 0x19b   :  { %v2277_v59 = vpop.permute.xlu0 %506 }
 0x1a2   :  { %v2275_v58 = vpop.permute.xlu1 %234 }
 0x1a4   :  { %v245_v61 = vpop.permute.xlu0 %244 }
 0x1aa   :  { %v2279_v60 = vpop.permute.xlu1 %447 }
 0x1ad   :  { %v2283_v63 = vpop.permute.xlu0 %510 }
 0x1b2   :  { %v2281_v62 = vpop.permute.xlu1 %514 }
 0x1b5   :  { %v2287_v1 = vpop.permute.xlu0 %449 }
 0x1ba   :  { %v2285_v0 = vpop.permute.xlu1 %451 }
 0x1bd   :  { %v255_v4 = vpop.permute.xlu0 %254 }
 0x1c2   :  { %v2291_v3 = vpop.permute.xlu1 %518 }
 0x1c5   :  { %v2295_v7 = vpop.permute.xlu0 %453 }
 0x1ca   :  { %v2293_v6 = vpop.permute.xlu1 %522 }
 0x1cd   :  { %v260_v23 = vpop.permute.xlu0 %259 }
 0x1d2   :  { %v456_v18 = vpop.permute.xlu1 %455 }
 0x1ee   :  { %v211_v8 = vpop.trf.xlu2 }
 0x1ef   :  { %v2297_v9 = vperm.slane %v211_v8, 0  ;;  %1904 = vset.pattern.permute.xlu2 %v2119_v34 }
 0x1f1   :  { %v271_v11 = vadd.f32 %v2297_v9, %v245_v61  ;;  %v270_v12 = vadd.f32 %v2297_v9, %v240_v57  ;;  %v272_v14 = vadd.f32 %v2297_v9, %v250_v5  ;;  %v273_v15 = vadd.f32 %v2297_v9, %v255_v4 }
 0x1f2   :  { %v268_v28 = vadd.f32 %v2297_v9, %v230_v53  ;;  %v274_v32 = vadd.f32 %v2297_v9, %v260_v23  ;;  %v265_v53 = vpop.permute.xlu1 %264  ;;  %v2346_v57 = vunpack.c.l.bf16 %v1881_v50 }
 0x1f3   :  { %v279_v17 = vmul.f32 0.2, %v271_v11  ;;  %v278_v21 = vmul.f32 0.2, %v270_v12  ;;  %v280_v22 = vmul.f32 0.2, %v272_v14  ;;  %v275_v4 = vadd.f32 %v2297_v9, %v265_v53 }
 0x1f4   :  { %v281_v26 = vmul.f32 0.2, %v273_v15  ;;  %v276_v41 = vmul.f32 0.2, %v268_v28  ;;  %v282_v46 = vmul.f32 0.2, %v274_v32 }
 0x1f5   :  { %v287_v24 = vmax.f32 %v271_v11, %v279_v17  ;;  %v286_v29 = vmax.f32 %v270_v12, %v278_v21  ;;  %v288_v30 = vmax.f32 %v272_v14, %v280_v22  ;;  %v283_v10 = vmul.f32 0.2, %v275_v4 }
 0x1f6   :  { %v289_v39 = vmax.f32 %v273_v15, %v281_v26  ;;  %v284_v49 = vmax.f32 %v268_v28, %v276_v41  ;;  %v290_v61 = vmax.f32 %v274_v32, %v282_v46  ;;  %v2361_v15 = vunpack.c.h.bf16 %v1881_v50 }
 0x1f7   :  { %v2318_v31 = vadd.f32 %v2310_v16, %v287_v24  ;;  %v2322_v33 = vadd.f32 %v2312_v19, %v286_v29  ;;  %v2329_v38 = vadd.f32 %v2314_v25, %v288_v30  ;;  %v291_v13 = vmax.f32 %v275_v4, %v283_v10 }
 0x1f8   :  { %v2341_v48 = vadd.f32 %v2324_v36, %v289_v39  ;;  %v2352_v8 = vadd.f32 %v2336_v45, %v284_v49  ;;  %v2357_v12 = vadd.f32 %v2346_v57, %v290_v61  ;;  %v2397_v32 = vunpack.c.h.bf16 %v1864_v40 }
 0x1f9   :  { %v310_v37 = vsel %vm300_vm1, %v2318_v31, -inf  ;;  %v307_v44 = vsel %vm300_vm1, %v2322_v33, -inf  ;;  %v313_v47 = vsel %vm300_vm1, %v2329_v38, -inf  ;;  %v2364_v17 = vadd.f32 %v2361_v15, %v291_v13 }
 0x1fa   :  { %311 = vmax.xlane.f32.xlu1 %v310_v37  ;;  %308 = vmax.xlane.f32.xlu0 %v307_v44  ;;  %v316_v5 = vsel %vm300_vm1, %v2341_v48, -inf  ;;  %v301_v11 = vsel %vm300_vm1, %v2352_v8, -inf  ;;  %v319_v14 = vsel %vm300_vm1, %v2357_v12, -inf }
 0x1fb   :  { %v322_v21 = vsel %vm300_vm1, %v2364_v17, -inf }
 0x1fe   :  { %314 = vmax.xlane.f32.xlu2 %v313_v47 }
 0x202   :  { %317 = vmax.xlane.f32.xlu1 %v316_v5 }
 0x206   :  { %302 = vmax.xlane.f32.xlu2 %v301_v11 }
 0x20a   :  { %320 = vmax.xlane.f32.xlu1 %v319_v14 }
 0x212   :  { %323 = vmax.xlane.f32.xlu1 %v322_v21 }
 0x21e   :  { %526 = vperm.xlu2 %1904, %v2260_v51  }
 0x223   :  { %465 = vxpose.xlu0.b32.start [1/8] (short) (narrow) %v2267_v52, 8 }
 0x226   :  { %660 = vrot.lane.b32.xlu2 %v2231_v42, %s2122_s1 }
 0x22b   :  { %466 = vxpose.xlu0.b32.cont [2/8] (short) (narrow) %v2269_v54, 8 }
 0x233   :  { %467 = vxpose.xlu0.b32.cont [3/8] (short) (narrow) %v2289_v2, 8 }
 0x23b   :  { %468 = vxpose.xlu0.b32.cont [4/8] (short) (narrow) %v2279_v60, 8  ;;  %v269_v60 = vadd.f32 %v2297_v9, %v2275_v58 }
 0x23d   :  { %v277_v30 = vmul.f32 0.2, %v269_v60 }
 0x23f   :  { %v285_v41 = vmax.f32 %v269_v60, %v277_v30 }
 0x243   :  { %469 = vxpose.xlu0.b32.cont [5/8] (short) (narrow) %v2287_v1, 8 }
 0x24b   :  { %470 = vxpose.xlu0.b32.cont [6/8] (short) (narrow) %v2285_v0, 8 }
 0x253   :  { %471 = vxpose.xlu0.b32.cont [7/8] (short) (narrow) %v2295_v7, 8 }
 0x25b   :  { %472 = vxpose.xlu0.b32.end [8/8] (short) (narrow) %v456_v18, 8 }
 0x26d   :  { %v309_v42 = vpop.xlane.xlu0 %308  ;;  %v2393_v18 = vpop.xlane.xlu1 %311 }
 0x271   :  { %v315_v51 = vpop.xlane.xlu2 %314 }
 0x272   :  { %v329_v5 = vsub.f32 %v2329_v38, %v315_v51 }
 0x274   :  { %v341_v14 = vmul.f32 1.442695, %v329_v5 }
 0x275   :  { %v318_v50 = vpop.xlane.xlu1 %317 }
 0x279   :  { %v2378_v22 = vpop.xlane.xlu2 %302 }
 0x281   :  { %v2380_v52 = vpop.permute.xlu2 %526 }
 0x289   :  { %v661_v23 = vpop.permute.xlu2 %660 }
 0x28a   :  { %685 = vmatpush.bf16.msrb.mxu3 %v661_v23 }
 0x2c2   :  { %1925 = vset.pattern.permute.xlu0 %v2119_v34 }
 0x2c7   :  { %v481_v54 = vpop.trf.xlu0 }
 0x2c8   :  { %v2383_v2 = vperm.slane %v481_v54, 0 }
 0x2ca   :  { %v531_v0 = vadd.f32 %v2383_v2, %v2273_v56  ;;  %v530_v1 = vadd.f32 %v2383_v2, %v2271_v55  ;;  %v534_v7 = vadd.f32 %v2383_v2, %v2281_v62  ;;  %v536_v24 = vadd.f32 %v2383_v2, %v2293_v6 }
 0x2cb   :  { %v327_v6 = vsub.f32 %v2322_v33, %v309_v42  ;;  %v532_v47 = vadd.f32 %v2383_v2, %v2277_v59  ;;  %v2418_v33 = vadd.f32 %v2397_v32, %v285_v41  ;;  %v533_v11 = vadd.f32 %v2383_v2, %v2283_v63  ;;  %v321_v42 = vpop.xlane.xlu1 %320 }
 0x2cc   :  { %v539_v26 = vmul.f32 0.2, %v531_v0  ;;  %v538_v28 = vmul.f32 0.2, %v530_v1  ;;  %v542_v29 = vmul.f32 0.2, %v534_v7  ;;  %v331_v51 = vsub.f32 %v2357_v12, %v321_v42 }
 0x2cd   :  { %v544_v37 = vmul.f32 0.2, %v536_v24  ;;  %v337_v53 = vmul.f32 1.442695, %v327_v6  ;;  %v540_v61 = vmul.f32 0.2, %v532_v47  ;;  %v535_v60 = vadd.f32 %v2383_v2, %v2291_v3 }
 0x2ce   :  { %v547_v58 = vmax.f32 %v531_v0, %v539_v26  ;;  %v546_v9 = vmax.f32 %v530_v1, %v538_v28  ;;  %v550_v56 = vmax.f32 %v534_v7, %v542_v29  ;;  %v304_v10 = vsel %vm300_vm1, %v2418_v33, -inf }
 0x2cf   :  { %v552_v49 = vmax.f32 %v536_v24, %v544_v37  ;;  %1959 = vpow2.f32 %v337_v53  ;;  %v548_v59 = vmax.f32 %v532_v47, %v540_v61  ;;  %v541_v23 = vmul.f32 0.2, %v533_v11 }
 0x2d0   :  { %v2400_v55 = vadd.f32 %v2397_v32, %v547_v58  ;;  %v2403_v62 = vadd.f32 %v2336_v45, %v546_v9  ;;  %v2406_v39 = vadd.f32 %v2314_v25, %v550_v56  ;;  %1961 = vpow2.f32 %v341_v14 }
 0x2d1   :  { %v2421_v4 = vadd.f32 %v2346_v57, %v552_v49  ;;  %v2431_v21 = vadd.f32 %v2312_v19, %v548_v59  ;;  %v549_v63 = vmax.f32 %v533_v11, %v541_v23  ;;  %v345_v1 = vmul.f32 1.442695, %v331_v51 }
 0x2d2   :  { %v565_v40 = vsel %vm300_vm1, %v2400_v55, -inf  ;;  %v562_v44 = vsel %vm300_vm1, %v2403_v62, -inf  ;;  %v574_v46 = vsel %vm300_vm1, %v2406_v39, -inf  ;;  %v543_v24 = vmul.f32 0.2, %v535_v60 }
 0x2d3   :  { %566 = vmax.xlane.f32.xlu0 %v565_v40  ;;  %563 = vmax.xlane.f32.xlu1 %v562_v44  ;;  %v580_v13 = vsel %vm300_vm1, %v2421_v4, -inf  ;;  %v568_v54 = vsel %vm300_vm1, %v2431_v21, -inf  ;;  %v2443_v7 = vadd.f32 %v2310_v16, %v549_v63  ;;  %1963 = vpow2.f32 %v345_v1 }
 0x2d4   :  { %575 = vmax.xlane.f32.xlu2 %v574_v46  ;;  %v551_v3 = vmax.f32 %v535_v60, %v543_v24  ;;  %v537_v28 = vadd.f32 %v2383_v2, %v2380_v52  ;;  %v330_v41 = vsub.f32 %v2341_v48, %v318_v50 }
 0x2d5   :  { %v2433_v38 = vpop.eup %1959  ;;  %v571_v12 = vsel %vm300_vm1, %v2443_v7, -inf }
 0x2d6   :  { %v355_v0 = vsel %vm300_vm1, %v2433_v38, 0.0  ;;  %v2445_v26 = vpop.eup %1961  ;;  %v2456_v30 = vadd.f32 %v2324_v36, %v551_v3  ;;  %v545_v58 = vmul.f32 0.2, %v537_v28 }
 0x2d7   :  { %v361_v29 = vsel %vm300_vm1, %v2445_v26, 0.0 }
 0x2d8   :  { %v577_v56 = vsel %vm300_vm1, %v2456_v30, -inf  ;;  %v553_v37 = vmax.f32 %v537_v28, %v545_v58 }
 0x2d9   :  { %v2458_v9 = vpop.eup %1963 }
 0x2da   :  { %v367_v52 = vsel %vm300_vm1, %v2458_v9, 0.0  ;;  %v2467_v6 = vadd.f32 %v2361_v15, %v553_v37 }
 0x2db   :  { %305 = vmax.xlane.f32.xlu1 %v304_v10 }
 0x2dc   :  { %581 = vmax.xlane.f32.xlu2 %v580_v13  ;;  %v583_v40 = vsel %vm300_vm1, %v2467_v6, -inf }
 0x2e3   :  { %569 = vmax.xlane.f32.xlu1 %v568_v54 }
 0x2e4   :  { %356 = vadd.xlane.f32.xlu2 %v355_v0 }
 0x2e7   :  { %658 = vrot.lane.b32.xlu0 %v2227_v35, %s2122_s1  ;;  %v328_v35 = vsub.f32 %v2318_v31, %v2393_v18  ;;  %v343_v31 = vmul.f32 1.442695, %v330_v41  ;;  %v324_v18 = vpop.xlane.xlu1 %323 }
 0x2e8   :  { %v332_v46 = vsub.f32 %v2364_v17, %v324_v18 }
 0x2e9   :  { %v339_v2 = vmul.f32 1.442695, %v328_v35 }
 0x2ea   :  { %v347_v49 = vmul.f32 1.442695, %v332_v46 }
 0x2eb   :  { %572 = vmax.xlane.f32.xlu1 %v571_v12  ;;  %1965 = vpow2.f32 %v339_v2 }
 0x2ec   :  { %362 = vadd.xlane.f32.xlu2 %v361_v29  ;;  %1967 = vpow2.f32 %v343_v31 }
 0x2ed   :  { %1969 = vpow2.f32 %v347_v49 }
 0x2f1   :  { %v2472_v44 = vpop.eup %1965 }
 0x2f2   :  { %v358_v47 = vsel %vm300_vm1, %v2472_v44, 0.0  ;;  %v2477_v53 = vpop.eup %1967 }
 0x2f3   :  { %578 = vmax.xlane.f32.xlu1 %v577_v56  ;;  %v364_v48 = vsel %vm300_vm1, %v2477_v53, 0.0  ;;  %v2483_v50 = vpop.eup %1969 }
 0x2f4   :  { %368 = vadd.xlane.f32.xlu2 %v367_v52  ;;  %v370_v17 = vsel %vm300_vm1, %v2483_v50, 0.0 }
 0x2fb   :  { %584 = vmax.xlane.f32.xlu1 %v583_v40 }
 0x303   :  { %359 = vadd.xlane.f32.xlu1 %v358_v47 }
 0x30b   :  { %365 = vadd.xlane.f32.xlu1 %v364_v48 }
 0x30c   :  { %654 = vrot.lane.b32.xlu2 %v2218_v20, %s2122_s1 }
 0x313   :  { %371 = vadd.xlane.f32.xlu1 %v370_v17 }
 0x346   :  { %v564_v61 = vpop.xlane.xlu1 %563  ;;  %v567_v5 = vpop.xlane.xlu0 %566 }
 0x347   :  { %v586_v10 = vsub.f32 %v2403_v62, %v564_v61  ;;  %v587_v11 = vsub.f32 %v2400_v55, %v567_v5  ;;  %v2498_v60 = vpop.xlane.xlu2 %575 }
 0x349   :  { %v594_v59 = vmul.f32 1.442695, %v586_v10  ;;  %v596_v13 = vmul.f32 1.442695, %v587_v11 }
 0x34b   :  { %1971 = vpow2.f32 %v594_v59 }
 0x34c   :  { %1973 = vpow2.f32 %v596_v13 }
 0x34e   :  { %v306_v14 = vpop.xlane.xlu1 %305 }
 0x34f   :  { %v326_v12 = vsub.f32 %v2418_v33, %v306_v14  ;;  %v582_v35 = vpop.xlane.xlu2 %581 }
 0x350   :  { %v592_v31 = vsub.f32 %v2421_v4, %v582_v35 }
 0x351   :  { %v2489_v23 = vpop.eup %1971  ;;  %v335_v28 = vmul.f32 1.442695, %v326_v12 }
 0x352   :  { %v610_v20 = vsel %vm300_vm1, %v2489_v23, 0.0  ;;  %v2494_v54 = vpop.eup %1973  ;;  %v606_v47 = vmul.f32 1.442695, %v592_v31 }
 0x353   :  { %611 = vadd.xlane.f32.xlu1 %v610_v20  ;;  %v613_v55 = vsel %vm300_vm1, %v2494_v54, 0.0 }
 0x356   :  { %v570_v42 = vpop.xlane.xlu1 %569 }
 0x357   :  { %v588_v51 = vsub.f32 %v2431_v21, %v570_v42 }
 0x359   :  { %v598_v63 = vmul.f32 1.442695, %v588_v51  ;;  %v659_v62 = vpop.permute.xlu0 %658 }
 0x35a   :  { %686 = vmatpush.bf16.msrb.mxu3 %v659_v62 }
 0x35b   :  { %1975 = vpow2.f32 %v598_v63  ;;  %614 = vadd.xlane.f32.xlu1 %v613_v55 }
 0x35e   :  { %v573_v0 = vpop.xlane.xlu1 %572 }
 0x35f   :  { %v589_v1 = vsub.f32 %v2443_v7, %v573_v0  ;;  %v325_v7 = vsub.f32 %v2352_v8, %v2378_v22  ;;  %v357_v8 = vpop.xlane.xlu2 %356 }
 0x361   :  { %v2501_v24 = vpop.eup %1975  ;;  %v600_v21 = vmul.f32 1.442695, %v589_v1  ;;  %v333_v52 = vmul.f32 1.442695, %v325_v7  ;;  %v2552_v7 = vld [vmem:[%s2941_s4] ss:$0 sm:$0xff] }
 0x362   :  { %v616_v3 = vsel %vm300_vm1, %v2501_v24, 0.0  ;;  %s2123_s4 = smov 8  }
 0x363   :  { %1977 = vpow2.f32 %v600_v21  ;;  %617 = vadd.xlane.f32.xlu2 %v616_v3 }
 0x364   :  { %1979 = vpow2.f32 %v335_v28 }
 0x366   :  { %v579_v29 = vpop.xlane.xlu1 %578 }
 0x367   :  { %v591_v58 = vsub.f32 %v2456_v30, %v579_v29  ;;  %v363_v14 = vpop.xlane.xlu2 %362 }
 0x369   :  { %v2507_v56 = vpop.eup %1977  ;;  %v604_v37 = vmul.f32 1.442695, %v591_v58 }
 0x36a   :  { %v619_v33 = vsel %vm300_vm1, %v2507_v56, 0.0  ;;  %v2513_v41 = vpop.eup %1979 }
 0x36b   :  { %1981 = vpow2.f32 %v604_v37  ;;  %620 = vadd.xlane.f32.xlu0 %v619_v33  ;;  %v352_v22 = vsel %vm300_vm1, %v2513_v41, 0.0 }
 0x36c   :  { %1983 = vpow2.f32 %v333_v52 }
 0x36e   :  { %v585_v2 = vpop.xlane.xlu1 %584 }
 0x36f   :  { %v593_v40 = vsub.f32 %v2467_v6, %v585_v2  ;;  %v369_v1 = vpop.xlane.xlu2 %368 }
 0x371   :  { %v2516_v30 = vpop.eup %1981  ;;  %v608_v18 = vmul.f32 1.442695, %v593_v40 }
 0x372   :  { %v625_v46 = vsel %vm300_vm1, %v2516_v30, 0.0  ;;  %v2525_v49 = vpop.eup %1983 }
 0x373   :  { %1985 = vpow2.f32 %v608_v18  ;;  %353 = vadd.xlane.f32.xlu0 %v352_v22  ;;  %626 = vadd.xlane.f32.xlu2 %v625_v46  ;;  %v349_v48 = vsel %vm300_vm1, %v2525_v49, 0.0 }
 0x374   :  { %1987 = vrcp.f32 %v357_v8  ;;  %656 = vrot.lane.b32.xlu1 %v2222_v27, %s2122_s1 }
 0x376   :  { %v360_v6 = vpop.xlane.xlu1 %359 }
 0x377   :  { %1989 = vrcp.f32 %v360_v6  ;;  %v655_v29 = vpop.permute.xlu2 %654 }
 0x378   :  { %1991 = vpow2.f32 %v606_v47 }
 0x379   :  { %v2527_v4 = vpop.eup %1985 }
 0x37a   :  { %v631_v17 = vsel %vm300_vm1, %v2527_v4, 0.0  ;;  %v1988_v61 = vpop.eup %1987 }
 0x37b   :  { %350 = vadd.xlane.f32.xlu2 %v349_v48  ;;  %632 = vadd.xlane.f32.xlu0 %v631_v17  ;;  %v383_v10 = vmul.f32 %v1988_v61, %v2433_v38  ;;  %v590_v38 = vsub.f32 %v2406_v39, %v2498_v60 }
 0x37d   :  { %v1990_v5 = vpop.eup %1989  ;;  %v602_v62 = vmul.f32 1.442695, %v590_v38 }
 0x37e   :  { %v384_v27 = vmul.f32 %v1990_v5, %v2472_v44  ;;  %v2535_v59 = vpop.eup %1991  ;;  %v366_v11 = vpop.xlane.xlu1 %365 }
 0x37f   :  { %v628_v20 = vsel %vm300_vm1, %v2535_v59, 0.0  ;;  %1993 = vrcp.f32 %v366_v11 }
 0x380   :  { %v390_v13 = vpack.c.bf16 %v384_v27, %v383_v10  ;;  %1995 = vrcp.f32 %v363_v14 }
 0x382   :  { %1811 = vmatmul.msk.bf16.vlgmr.msra.gmra.mxu3 %vm300_vm1, %v390_v13 }
 0x383   :  { %629 = vadd.xlane.f32.xlu2 %v628_v20 }
 0x385   :  { %v1994_v42 = vpop.eup %1993 }
 0x386   :  { %v1996_v51 = vpop.eup %1995  ;;  %v386_v44 = vmul.f32 %v1994_v42, %v2477_v53  ;;  %v372_v55 = vpop.xlane.xlu1 %371 }
 0x387   :  { %v385_v63 = vmul.f32 %v1996_v51, %v2445_v26  ;;  %1997 = vrcp.f32 %v372_v55 }
 0x388   :  { %1999 = vpow2.f32 %v602_v62 }
 0x389   :  { %v391_v0 = vpack.c.bf16 %v386_v44, %v385_v63  ;;  %2001 = vrcp.f32 %v369_v1 }
 0x38d   :  { %v1998_v12 = vpop.eup %1997 }
 0x38e   :  { %v2000_v21 = vpop.eup %1999  ;;  %v388_v28 = vmul.f32 %v1998_v12, %v2483_v50 }
 0x38f   :  { %v2002_v3 = vpop.eup %2001  ;;  %v622_v39 = vsel %vm300_vm1, %v2000_v21, 0.0 }
 0x390   :  { %v387_v53 = vmul.f32 %v2002_v3, %v2458_v9 }
 0x392   :  { %1812 = vmatmul.msk.bf16.gmra.mxu3 %vm300_vm1, %v391_v0  ;;  %v392_v26 = vpack.c.bf16 %v388_v28, %v387_v53 }
 0x39e   :  { %623 = vadd.xlane.f32.xlu1 %v622_v39 }
 0x3a2   :  { %1813 = vmatmul.msk.bf16.gmra.mxu3 %vm300_vm1, %v392_v26 }
 0x3b7   :  { %666 = vrot.lane.b32.xlu1 %v2552_v7, %s2122_s1 }
 0x3c6   :  { %v612_v60 = vpop.xlane.xlu1 %611 }
 0x3ce   :  { %v615_v58 = vpop.xlane.xlu1 %614 }
 0x3cf   :  { %2003 = vrcp.f32 %v615_v58 }
 0x3d0   :  { %2005 = vrcp.f32 %v612_v60 }
 0x3d5   :  { %v2004_v9 = vpop.eup %2003 }
 0x3d6   :  { %v618_v35 = vpop.xlane.xlu2 %617  ;;  %v2006_v52 = vpop.eup %2005  ;;  %v643_v2 = vmul.f32 %v2004_v9, %v2494_v54 }
 0x3d7   :  { %v642_v40 = vmul.f32 %v2006_v52, %v2489_v23 }
 0x3d9   :  { %v650_v18 = vpack.c.bf16 %v643_v2, %v642_v40 }
 0x3de   :  { %v621_v37 = vpop.xlane.xlu0 %620 }
 0x3e6   :  { %v627_v50 = vpop.xlane.xlu2 %626  ;;  %v657_v33 = vpop.permute.xlu1 %656 }
 0x3e7   :  { %687 = vmatpush.bf16.msrb.mxu3 %v657_v33  ;;  %v354_v31 = vpop.xlane.xlu0 %353 }
 0x3e8   :  { %2007 = vrcp.f32 %v354_v31  ;;  %v1860_v31 = vld [vmem:[%s2942_s5] sm:$0xff] }
 0x3e9   :  { %2009 = vrcp.f32 %v621_v37  ;;  %785 = vmatpush.bf16.msrb.mxu0 %v1860_v31 }
 0x3eb   :  { %688 = vmatpush.bf16.msrb.mxu3 %v655_v29 }
 0x3ee   :  { %v351_v8 = vpop.xlane.xlu2 %350  ;;  %1814 = vmatmul.msk.bf16.vlgmr.msrb.gmra.mxu3 %vm300_vm1, %v650_v18  ;;  %v2008_v22 = vpop.eup %2007 }
 0x3ef   :  { %2011 = vrcp.f32 %v351_v8  ;;  %v2010_v46 = vpop.eup %2009  ;;  %v382_v48 = vmul.f32 %v2008_v22, %v2513_v41  ;;  %v633_v20 = vpop.xlane.xlu0 %632 }
 0x3f0   :  { %2013 = vrcp.f32 %v618_v35  ;;  %v645_v23 = vmul.f32 %v2010_v46, %v2507_v56 }
 0x3f1   :  { %2015 = vrcp.f32 %v627_v50 }
 0x3f5   :  { %v2012_v47 = vpop.eup %2011 }
 0x3f6   :  { %v381_v6 = vmul.f32 %v2012_v47, %v2525_v49  ;;  %v2014_v54 = vpop.eup %2013  ;;  %v630_v41 = vpop.xlane.xlu2 %629 }
 0x3f7   :  { %v644_v61 = vmul.f32 %v2014_v54, %v2501_v24  ;;  %v2016_v27 = vpop.eup %2015 }
 0x3f8   :  { %v389_v17 = vpack.c.bf16 %v382_v48, %v381_v6  ;;  %v647_v49 = vmul.f32 %v2016_v27, %v2516_v30 }
 0x3f9   :  { %v651_v5 = vpack.c.bf16 %v645_v23, %v644_v61 }
 0x3fa   :  { %1810 = vmatmul.msk.bf16.vlgmr.msra.gmra.mxu2 %vm300_vm1, %v389_v17 }
 0x3fe   :  { %1815 = vmatmul.msk.bf16.gmra.mxu3 %vm300_vm1, %v651_v5 }
 0x405   :  { %v426_v44 = vpop.f32.mrf.mxu3 }
 0x406   :  { %v427_v5 = vadd.f32 %v2552_v7, %v426_v44 }
 0x40d   :  { %v428_v63 = vpop.f32.mrf.mxu3 }
 0x411   :  { %v624_v10 = vpop.xlane.xlu1 %623 }
 0x412   :  { %2017 = vrcp.f32 %v624_v10  ;;  %v429_v10 = vadd.f32 %v2552_v7, %v428_v63 }
 0x413   :  { %2019 = vrcp.f32 %v630_v41 }
 0x414   :  { %2021 = vrcp.f32 %v633_v20 }
 0x415   :  { %v431_v62 = vpop.f32.mrf.mxu3 }
 0x416   :  { %v432_v20 = vadd.f32 %v2552_v7, %v431_v62 }
 0x418   :  { %v2018_v11 = vpop.eup %2017 }
 0x419   :  { %v646_v13 = vmul.f32 %v2018_v11, %v2000_v21  ;;  %v2020_v56 = vpop.eup %2019 }
 0x41a   :  { %v2022_v24 = vpop.eup %2021  ;;  %v648_v42 = vmul.f32 %v2020_v56, %v2535_v59 }
 0x41b   :  { %v652_v14 = vpack.c.bf16 %v647_v49, %v646_v13  ;;  %v649_v51 = vmul.f32 %v2022_v24, %v2527_v4 }
 0x41d   :  { %1816 = vmatmul.msk.bf16.gmra.mxu3 %vm300_vm1, %v652_v14  ;;  %v653_v38 = vpack.c.bf16 %v649_v51, %v648_v42  ;;  %v433_v30 = vpop.f32.mrf.mxu3 }
 0x41e   :  { %v434_v56 = vadd.f32 %v2552_v7, %v433_v30 }
 0x425   :  { %v436_v55 = vpop.f32.mrf.mxu3 }
 0x429   :  { %v667_v12 = vpop.permute.xlu1 %666 }
 0x42d   :  { %1817 = vmatmul.msk.bf16.gmra.mxu3 %vm300_vm1, %v653_v38  ;;  %v438_v0 = vpop.f32.mrf.mxu3 }
 0x471   :  { %v690_v1 = vpop.f32.mrf.mxu3 }
 0x472   :  { %v691_v3 = vadd.f32 %v690_v1, %v667_v12  ;;  %v437_v1 = vadd.f32 %v2552_v7, %v436_v55 }
 0x479   :  { %v692_v21 = vpop.f32.mrf.mxu3 }
 0x47a   :  { %v693_v28 = vadd.f32 %v692_v21, %v667_v12 }
 0x47c   :  { %v1905_v39 = vpack.i.bf16 %v693_v28, %v691_v3 }
 0x47d   :  { %v421_v18 = vpop.f32.mrf.mxu2 }
 0x47e   :  { %1906 = vrot.lane.b32.xlu2 %v1905_v39, %s2123_s4  ;;  %v422_v46 = vadd.f32 %v2552_v7, %v421_v18  ;;  %v1861_v39 = vld [vmem:[%s2943_s6] sm:$0xff] }
 0x47f   :  { %860 = vmatpush.bf16.msrb.mxu1 %v1861_v39 }
 0x481   :  { %v695_v59 = vpop.f32.mrf.mxu3 }
 0x482   :  { %v696_v53 = vadd.f32 %v695_v59, %v667_v12 }
 0x485   :  { %v423_v8 = vpop.f32.mrf.mxu2 }
 0x486   :  { %v424_v47 = vadd.f32 %v2552_v7, %v423_v8 }
 0x489   :  { %v697_v4 = vpop.f32.mrf.mxu3 }
 0x48a   :  { %v698_v26 = vadd.f32 %v697_v4, %v667_v12 }
 0x48c   :  { %v1910_v60 = vpack.i.bf16 %v698_v26, %v696_v53 }
 0x48e   :  { %1911 = vrot.lane.b32.xlu0 %v1910_v60, %s2123_s4 }
 0x4a0   :  { %v700_v29 = vpop.f32.mrf.mxu3 }
 0x4a1   :  { %v701_v35 = vadd.f32 %v700_v29, %v667_v12 }
 0x4a8   :  { %v702_v58 = vpop.f32.mrf.mxu3 }
 0x4a9   :  { %v703_v37 = vadd.f32 %v702_v58, %v667_v12 }
 0x4ab   :  { %v1915_v9 = vpack.i.bf16 %v703_v37, %v701_v35 }
 0x4ad   :  { %1916 = vrot.lane.b32.xlu1 %v1915_v9, %s2123_s4 }
 0x4b0   :  { %v705_v50 = vpop.f32.mrf.mxu3 }
 0x4b1   :  { %v706_v52 = vadd.f32 %v705_v50, %v667_v12 }
 0x4b8   :  { %v707_v33 = vpop.f32.mrf.mxu3 }
 0x4b9   :  { %v708_v2 = vadd.f32 %v707_v33, %v667_v12  ;;  %v439_v12 = vadd.f32 %v2552_v7, %v438_v0 }
 0x4bb   :  { %v1920_v40 = vpack.i.bf16 %v708_v2, %v706_v52 }
 0x4bd   :  { %1921 = vrot.lane.b32.xlu0 %v1920_v40, %s2123_s4 }
 0x4d8   :  { %v1907_v22 = vpop.permute.xlu2 %1906 }
 0x4d9   :  { %v1909_v6 = vunpack.i.h.bf16 %v1907_v22  ;;  %v1908_v48 = vunpack.i.l.bf16 %v1907_v22 }
 0x4db   :  { %v744_v54 = vsel %vm742_vm2, %v424_v47, %v1909_v6  ;;  %v743_v17 = vsel %vm742_vm2, %v422_v46, %v1908_v48 }
 0x4dc   :  { %v756_v23 = vpack.c.bf16 %v744_v54, %v743_v17 }
 0x4de   :  { %1822 = vmatmul.msk.bf16.vlgmr.msrb.gmra.mxu0 %vm78_vm0, %v756_v23 }
 0x500   :  { %v1912_v61 = vpop.permute.xlu0 %1911 }
 0x501   :  { %v1914_v27 = vunpack.i.h.bf16 %v1912_v61  ;;  %v1913_v11 = vunpack.i.l.bf16 %v1912_v61 }
 0x503   :  { %v745_v13 = vsel %vm742_vm2, %v427_v5, %v1913_v11  ;;  %v746_v49 = vsel %vm742_vm2, %v429_v10, %v1914_v27 }
 0x504   :  { %v757_v41 = vpack.c.bf16 %v746_v49, %v745_v13 }
 0x506   :  { %1823 = vmatmul.msk.bf16.gmra.mxu0 %vm78_vm0, %v757_v41 }
 0x51f   :  { %v1917_v14 = vpop.permute.xlu1 %1916 }
 0x520   :  { %v1919_v24 = vunpack.i.h.bf16 %v1917_v14  ;;  %v1918_v42 = vunpack.i.l.bf16 %v1917_v14 }
 0x522   :  { %v747_v51 = vsel %vm742_vm2, %v432_v20, %v1918_v42  ;;  %v748_v38 = vsel %vm742_vm2, %v434_v56, %v1919_v24 }
 0x523   :  { %v758_v44 = vpack.c.bf16 %v748_v38, %v747_v51 }
 0x525   :  { %1824 = vmatmul.msk.bf16.gmra.mxu0 %vm78_vm0, %v758_v44 }
 0x52f   :  { %v1922_v63 = vpop.permute.xlu0 %1921 }
 0x530   :  { %v1924_v21 = vunpack.i.h.bf16 %v1922_v63  ;;  %v1923_v3 = vunpack.i.l.bf16 %v1922_v63 }
 0x532   :  { %v749_v62 = vsel %vm742_vm2, %v437_v1, %v1923_v3  ;;  %v750_v30 = vsel %vm742_vm2, %v439_v12, %v1924_v21 }
 0x533   :  { %v759_v28 = vpack.c.bf16 %v750_v30, %v749_v62 }
 0x535   :  { %1825 = vmatmul.msk.bf16.gmra.mxu0 %vm78_vm0, %v759_v28 }
 0x55b   :  { %v787_v59 = vpop.f32.mrf.mxu0 }
 0x55c   :  { %v807_v4 = vpack.c.bf16 %v787_v59, %v787_v59 }
 0x55e   :  { %v823_v26 = vunpack.c.l.b16 %v807_v4 }
 0x563   :  { %v789_v53 = vpop.f32.mrf.mxu0 }
 0x564   :  { %v808_v55 = vpack.c.bf16 %v789_v53, %v789_v53 }
 0x566   :  { %v824_v7 = vunpack.c.l.b16 %v808_v55 }
 0x568   :  { %v2600_v0 = vpack.c.b16 %v824_v7, %v823_v26 }
 0x56a   :  { %1830 = vmatmul.msk.bf16.vlgmr.msrb.gmra.mxu1 %vm78_vm0, %v2600_v0 }
 0x583   :  { %v792_v60 = vpop.f32.mrf.mxu0 }
 0x584   :  { %v809_v29 = vpack.c.bf16 %v792_v60, %v792_v60 }
 0x586   :  { %v825_v37 = vunpack.c.l.b16 %v809_v29 }
 0x58b   :  { %v794_v58 = vpop.f32.mrf.mxu0 }
 0x58c   :  { %v810_v35 = vpack.c.bf16 %v794_v58, %v794_v58 }
 0x58e   :  { %v826_v9 = vunpack.c.l.b16 %v810_v35 }
 0x590   :  { %v2604_v50 = vpack.c.b16 %v826_v9, %v825_v37 }
 0x592   :  { %1831 = vmatmul.msk.bf16.gmra.mxu1 %vm78_vm0, %v2604_v50 }
 0x5a2   :  { %v797_v33 = vpop.f32.mrf.mxu0 }
 0x5a3   :  { %v811_v52 = vpack.c.bf16 %v797_v33, %v797_v33 }
 0x5a5   :  { %v827_v31 = vunpack.c.l.b16 %v811_v52 }
 0x5aa   :  { %v799_v2 = vpop.f32.mrf.mxu0 }
 0x5ab   :  { %v812_v40 = vpack.c.bf16 %v799_v2, %v799_v2 }
 0x5ad   :  { %v828_v18 = vunpack.c.l.b16 %v812_v40 }
 0x5af   :  { %v2608_v8 = vpack.c.b16 %v828_v18, %v827_v31 }
 0x5b1   :  { %1832 = vmatmul.msk.bf16.gmra.mxu1 %vm78_vm0, %v2608_v8 }
 0x5b2   :  { %v802_v22 = vpop.f32.mrf.mxu0 }
 0x5b3   :  { %v813_v46 = vpack.c.bf16 %v802_v22, %v802_v22 }
 0x5b5   :  { %v829_v48 = vunpack.c.l.b16 %v813_v46 }
 0x5ba   :  { %v804_v47 = vpop.f32.mrf.mxu0 }
 0x5bb   :  { %v814_v6 = vpack.c.bf16 %v804_v47, %v804_v47 }
 0x5bd   :  { %v830_v54 = vunpack.c.l.b16 %v814_v6 }
 0x5bf   :  { %v834_v17 = vpack.c.b16 %v830_v54, %v829_v48 }
 0x5c1   :  { %1346 = vrot.lane.b32.xlu1 %v834_v17, %s2122_s1  ;;  %1833 = vmatmul.msk.bf16.gmra.mxu1 %vm78_vm0, %v834_v17 }
 0x5c2   :  { %1102 = vmatpush.bf16.msrb.mxu2 %v834_v17 }
 0x5c6   :  { %1103 = vmatpush.bf16.msrb.mxu2 %v2608_v8 }
 0x5ca   :  { %1104 = vmatpush.bf16.msrb.mxu2 %v2604_v50 }
 0x5ce   :  { %1105 = vmatpush.bf16.msrb.mxu2 %v2600_v0 }
 0x5e7   :  { %v862_v23 = vpop.f32.mrf.mxu1 }
 0x5e8   :  { %1184 = vperm.xlu0 %1925, %v862_v23   ;;  %1127 = vrot.lane.b32.xlu2 %v862_v23, %s2121_s0 }
 0x5e9   :  { %916 = vperm.xlu1 %1903, %v862_v23  }
 0x5ef   :  { %v864_v61 = vpop.f32.mrf.mxu1 }
 0x5f0   :  { %1926 = vset.pattern.permute.xlu0 %v2120_v43  ;;  %1188 = vperm.xlu2 %1904, %v864_v61  }
 0x5f1   :  { %1129 = vrot.lane.b32.xlu1 %v864_v61, %s2121_s0  ;;  %921 = vperm.xlu0 %1926, %v864_v61  }
 0x5f2   :  { %1927 = vset.pattern.permute.xlu1 %v2119_v34 }
 0x5f8   :  { %1933 = vset.pattern.permute.xlu2 %v2120_v43 }
 0x60f   :  { %v867_v5 = vpop.f32.mrf.mxu1 }
 0x610   :  { %1131 = vrot.lane.b32.xlu0 %v867_v5, %s2121_s0  ;;  %1192 = vperm.xlu1 %1927, %v867_v5  }
 0x617   :  { %v869_v10 = vpop.f32.mrf.mxu1 }
 0x618   :  { %926 = vperm.xlu0 %1926, %v867_v5   ;;  %1133 = vrot.lane.b32.xlu2 %v869_v10, %s2121_s0 }
 0x619   :  { %1929 = vset.pattern.permute.xlu1 %v2120_v43 }
 0x61a   :  { %931 = vperm.xlu1 %1929, %v869_v10  }
 0x620   :  { %1928 = vset.pattern.permute.xlu0 %v2119_v34 }
 0x621   :  { %1196 = vperm.xlu0 %1928, %v869_v10  }
 0x622   :  { %1930 = vset.pattern.permute.xlu1 %v2119_v34 }
 0x62e   :  { %v872_v27 = vpop.f32.mrf.mxu1 }
 0x62f   :  { %1135 = vrot.lane.b32.xlu1 %v872_v27, %s2121_s0 }
 0x633   :  { %v1347_v11 = vpop.permute.xlu1 %1346 }
 0x634   :  { %1371 = vmatpush.bf16.msra.mxu3 %v1347_v11 }
 0x636   :  { %v874_v13 = vpop.f32.mrf.mxu1 }
 0x637   :  { %1137 = vrot.lane.b32.xlu0 %v874_v13, %s2121_s0  ;;  %1200 = vperm.xlu1 %1930, %v872_v27  }
 0x63e   :  { %v877_v49 = vpop.f32.mrf.mxu1 }
 0x63f   :  { %1204 = vperm.xlu0 %1928, %v874_v13   ;;  %1931 = vset.pattern.permute.xlu1 %v2120_v43 }
 0x640   :  { %1139 = vrot.lane.b32.xlu2 %v877_v49, %s2121_s0  ;;  %936 = vperm.xlu1 %1931, %v872_v27  }
 0x642   :  { %v1128_v26 = vpop.permute.xlu2 %1127 }
 0x646   :  { %v879_v41 = vpop.f32.mrf.mxu1 }
 0x648   :  { %946 = vperm.xlu2 %1933, %v877_v49   ;;  %941 = vperm.xlu1 %1931, %v874_v13  }
 0x64a   :  { %v1189_v60 = vpop.permute.xlu2 %1188 }
 0x650   :  { %1932 = vset.pattern.permute.xlu1 %v2119_v34 }
 0x651   :  { %1208 = vperm.xlu1 %1932, %v877_v49  }
 0x659   :  { %1141 = vrot.lane.b32.xlu1 %v879_v41, %s2121_s0 }
 0x65a   :  { %v1185_v14 = vpop.permute.xlu0 %1184 }
 0x65b   :  { %v917_v63 = vpop.permute.xlu1 %916 }
 0x661   :  { %882 = vxpose.xlu0.b32.start [1/8] (short) (narrow) %v862_v23, 8  ;;  %1212 = vperm.xlu1 %1932, %v879_v41  }
 0x663   :  { %v922_v20 = vpop.permute.xlu0 %921  ;;  %v1130_v4 = vpop.permute.xlu1 %1129 }
 0x669   :  { %883 = vxpose.xlu0.b32.cont [2/8] (short) (narrow) %v864_v61, 8  ;;  %1934 = vset.pattern.permute.xlu1 %v2120_v43 }
 0x66a   :  { %951 = vperm.xlu1 %1934, %v879_v41  }
 0x671   :  { %884 = vxpose.xlu0.b32.cont [3/8] (short) (narrow) %v867_v5, 8 }
 0x672   :  { %v1134_v58 = vpop.permute.xlu2 %1133 }
 0x679   :  { %885 = vxpose.xlu0.b32.cont [4/8] (short) (narrow) %v869_v10, 8 }
 0x681   :  { %886 = vxpose.xlu0.b32.cont [5/8] (short) (narrow) %v872_v27, 8 }
 0x682   :  { %v1132_v56 = vpop.permute.xlu0 %1131  ;;  %v1193_v53 = vpop.permute.xlu1 %1192 }
 0x689   :  { %887 = vxpose.xlu0.b32.cont [6/8] (short) (narrow) %v874_v13, 8 }
 0x68a   :  { %v2634_v34 = vpop.permute.xlu0 %926 }
 0x68c   :  { %v932_v55 = vpop.permute.xlu1 %931 }
 0x691   :  { %888 = vxpose.xlu0.b32.cont [7/8] (short) (narrow) %v877_v49, 8 }
 0x693   :  { %v1197_v24 = vpop.permute.xlu0 %1196 }
 0x699   :  { %889 = vxpose.xlu0.b32.end [8/8] (short) (narrow) %v879_v41, 8 }
 0x69a   :  { %v1140_v33 = vpop.permute.xlu2 %1139 }
 0x6a1   :  { %v1136_v7 = vpop.permute.xlu1 %1135 }
 0x6a2   :  { %v2655_v2 = vpop.permute.xlu2 %946 }
 0x6a9   :  { %v1138_v42 = vpop.permute.xlu0 %1137  ;;  %v1201_v29 = vpop.permute.xlu1 %1200 }
 0x6b1   :  { %v1205_v51 = vpop.permute.xlu0 %1204 }
 0x6b2   :  { %v2651_v35 = vpop.permute.xlu1 %936 }
 0x6ba   :  { %v2653_v37 = vpop.permute.xlu1 %941 }
 0x6c3   :  { %v1209_v9 = vpop.permute.xlu1 %1208 }
 0x6cb   :  { %v1142_v52 = vpop.permute.xlu1 %1141 }
 0x700   :  { %1955 = vset.pattern.permute.xlu0 %v2120_v43 }
 0x705   :  { %v898_v38 = vpop.trf.xlu0 }
 0x706   :  { %v2637_v44 = vperm.slane %v898_v38, 0 }
 0x708   :  { %v955_v1 = vadd.f32 %v2637_v44, %v917_v63  ;;  %v956_v12 = vadd.f32 %v2637_v44, %v922_v20 }
 0x70a   :  { %v963_v21 = vmul.f32 0.2, %v955_v1  ;;  %v964_v3 = vmul.f32 0.2, %v956_v12 }
 0x70c   :  { %v971_v62 = vmax.f32 %v955_v1, %v963_v21  ;;  %v972_v30 = vmax.f32 %v956_v12, %v964_v3  ;;  %v1213_v1 = vpop.permute.xlu1 %1212 }
 0x70e   :  { %v2642_v28 = vadd.f32 %v2336_v45, %v971_v62  ;;  %v2645_v39 = vadd.f32 %v2397_v32, %v972_v30 }
 0x710   :  { %v987_v43 = vsel %vm300_vm1, %v2642_v28, -inf  ;;  %v990_v59 = vsel %vm300_vm1, %v2645_v39, -inf }
 0x711   :  { %988 = vmax.xlane.f32.xlu2 %v987_v43  ;;  %991 = vmax.xlane.f32.xlu1 %v990_v59 }
 0x73a   :  { %1151 = vxpose.xlu2.b32.start [1/8] (short) (narrow) %v1128_v26, 8 }
 0x742   :  { %1152 = vxpose.xlu2.b32.cont [2/8] (short) (narrow) %v1130_v4, 8 }
 0x74a   :  { %1153 = vxpose.xlu2.b32.cont [3/8] (short) (narrow) %v1132_v56, 8 }
 0x752   :  { %1154 = vxpose.xlu2.b32.cont [4/8] (short) (narrow) %v1134_v58, 8 }
 0x75a   :  { %1155 = vxpose.xlu2.b32.cont [5/8] (short) (narrow) %v1136_v7, 8 }
 0x762   :  { %1156 = vxpose.xlu2.b32.cont [6/8] (short) (narrow) %v1138_v42, 8 }
 0x76a   :  { %1157 = vxpose.xlu2.b32.cont [7/8] (short) (narrow) %v1140_v33, 8 }
 0x772   :  { %1158 = vxpose.xlu2.b32.end [8/8] (short) (narrow) %v1142_v52, 8 }
 0x784   :  { %v2657_v40 = vpop.xlane.xlu2 %988 }
 0x7d3   :  { %v1167_v31 = vpop.trf.xlu2 }
 0x7d4   :  { %v1215_v18 = vperm.slane %v1167_v31, 0 }
 0x7d6   :  { %v1217_v22 = vadd.f32 %v1215_v18, %v1189_v60  ;;  %v1216_v46 = vadd.f32 %v1215_v18, %v1185_v14  ;;  %v1218_v47 = vadd.f32 %v1215_v18, %v1193_v53  ;;  %v1219_v6 = vadd.f32 %v1215_v18, %v1197_v24 }
 0x7d7   :  { %v1221_v48 = vadd.f32 %v1215_v18, %v1205_v51  ;;  %v1222_v5 = vadd.f32 %v1215_v18, %v1209_v9  ;;  %v1220_v42 = vadd.f32 %v1215_v18, %v1201_v29  ;;  %v957_v14 = vadd.f32 %v2637_v44, %v2634_v34 }
 0x7d8   :  { %v1225_v54 = vmul.f32 0.2, %v1217_v22  ;;  %v1224_v17 = vmul.f32 0.2, %v1216_v46  ;;  %v1226_v23 = vmul.f32 0.2, %v1218_v47  ;;  %v1223_v3 = vadd.f32 %v1215_v18, %v1213_v1 }
 0x7d9   :  { %v1227_v61 = vmul.f32 0.2, %v1219_v6  ;;  %v1229_v13 = vmul.f32 0.2, %v1221_v48  ;;  %v1230_v56 = vmul.f32 0.2, %v1222_v5  ;;  %v958_v53 = vadd.f32 %v2637_v44, %v932_v55 }
 0x7da   :  { %v1233_v10 = vmax.f32 %v1217_v22, %v1225_v54  ;;  %v1232_v27 = vmax.f32 %v1216_v46, %v1224_v17  ;;  %v1234_v11 = vmax.f32 %v1218_v47, %v1226_v23  ;;  %v1228_v12 = vmul.f32 0.2, %v1220_v42  ;;  %v952_v54 = vpop.permute.xlu1 %951 }
 0x7db   :  { %v1235_v20 = vmax.f32 %v1219_v6, %v1227_v61  ;;  %v1237_v63 = vmax.f32 %v1221_v48, %v1229_v13  ;;  %v965_v21 = vmul.f32 0.2, %v957_v14  ;;  %v1238_v43 = vmax.f32 %v1222_v5, %v1230_v56 }
 0x7dc   :  { %v1241_v49 = vadd.f32 %v2397_v32, %v1233_v10  ;;  %v1240_v41 = vadd.f32 %v2336_v45, %v1232_v27  ;;  %v1242_v38 = vadd.f32 %v2312_v19, %v1234_v11  ;;  %v1231_v4 = vmul.f32 0.2, %v1223_v3 }
 0x7dd   :  { %v2668_v30 = vadd.f32 %v2310_v16, %v1235_v20  ;;  %v1245_v34 = vadd.f32 %v2324_v36, %v1237_v63  ;;  %v973_v59 = vmax.f32 %v957_v14, %v965_v21  ;;  %v2676_v60 = vadd.f32 %v2346_v57, %v1238_v43 }
 0x7de   :  { %v1251_v24 = vsel %vm300_vm1, %v1241_v49, -inf  ;;  %v1248_v51 = vsel %vm300_vm1, %v1240_v41, -inf  ;;  %v1254_v62 = vsel %vm300_vm1, %v1242_v38, -inf  ;;  %v1236_v29 = vmax.f32 %v1220_v42, %v1228_v12 }
 0x7df   :  { %1252 = vmax.xlane.f32.xlu1 %v1251_v24  ;;  %1249 = vmax.xlane.f32.xlu0 %v1248_v51  ;;  %v1257_v26 = vsel %vm300_vm1, %v2668_v30, -inf  ;;  %v1263_v7 = vsel %vm300_vm1, %v1245_v34, -inf  ;;  %v966_v58 = vmul.f32 0.2, %v958_v53  ;;  %v1266_v9 = vsel %vm300_vm1, %v2676_v60, -inf }
 0x7e0   :  { %v2681_v33 = vadd.f32 %v2314_v25, %v1236_v29  ;;  %v2684_v55 = vadd.f32 %v2312_v19, %v973_v59  ;;  %v1239_v52 = vmax.f32 %v1223_v3, %v1231_v4  ;;  %v960_v42 = vadd.f32 %v2637_v44, %v2653_v37 }
 0x7e1   :  { %v974_v46 = vmax.f32 %v958_v53, %v966_v58 }
 0x7e2   :  { %v1260_v31 = vsel %vm300_vm1, %v2681_v33, -inf  ;;  %v993_v18 = vsel %vm300_vm1, %v2684_v55, -inf  ;;  %v2691_v22 = vadd.f32 %v2361_v15, %v1239_v52  ;;  %v2699_v17 = vpop.xlane.xlu1 %991 }
 0x7e3   :  { %1255 = vmax.xlane.f32.xlu2 %v1254_v62  ;;  %v982_v6 = vadd.f32 %v2310_v16, %v974_v46  ;;  %v962_v62 = vadd.f32 %v2637_v44, %v952_v54 }
 0x7e4   :  { %v1269_v47 = vsel %vm300_vm1, %v2691_v22, -inf }
 0x7e5   :  { %v996_v48 = vsel %vm300_vm1, %v982_v6, -inf  ;;  %v970_v4 = vmul.f32 0.2, %v962_v62 }
 0x7e7   :  { %1258 = vmax.xlane.f32.xlu1 %v1257_v26  ;;  %1264 = vmax.xlane.f32.xlu0 %v1263_v7  ;;  %v978_v7 = vmax.f32 %v962_v62, %v970_v4 }
 0x7eb   :  { %1267 = vmax.xlane.f32.xlu2 %v1266_v9  ;;  %v2729_v9 = vadd.f32 %v2361_v15, %v978_v7 }
 0x7ef   :  { %1261 = vmax.xlane.f32.xlu1 %v1260_v31  ;;  %994 = vmax.xlane.f32.xlu0 %v993_v18 }
 0x7f3   :  { %1270 = vmax.xlane.f32.xlu2 %v1269_v47 }
 0x7f7   :  { %997 = vmax.xlane.f32.xlu0 %v996_v48 }
 0x808   :  { %1342 = vrot.lane.b32.xlu1 %v2604_v50, %s2122_s1 }
 0x852   :  { %v1250_v23 = vpop.xlane.xlu0 %1249  ;;  %v1253_v61 = vpop.xlane.xlu1 %1252 }
 0x853   :  { %v1272_v5 = vsub.f32 %v1240_v41, %v1250_v23  ;;  %v1273_v10 = vsub.f32 %v1241_v49, %v1253_v61  ;;  %v968_v49 = vmul.f32 0.2, %v960_v42  ;;  %v1012_v61 = vsub.f32 %v2645_v39, %v2699_v17 }
 0x855   :  { %v1280_v27 = vmul.f32 1.442695, %v1272_v5  ;;  %v1282_v11 = vmul.f32 1.442695, %v1273_v10  ;;  %v976_v1 = vmax.f32 %v960_v42, %v968_v49  ;;  %v961_v10 = vadd.f32 %v2637_v44, %v2655_v2 }
 0x856   :  { %v1256_v13 = vpop.xlane.xlu2 %1255 }
 0x857   :  { %2023 = vpow2.f32 %v1280_v27  ;;  %v1274_v20 = vsub.f32 %v1242_v38, %v1256_v13  ;;  %v2716_v21 = vadd.f32 %v2324_v36, %v976_v1  ;;  %v1021_v27 = vmul.f32 1.442695, %v1012_v61 }
 0x858   :  { %2025 = vpow2.f32 %v1282_v11 }
 0x859   :  { %v1284_v56 = vmul.f32 1.442695, %v1274_v20  ;;  %v1002_v3 = vsel %vm300_vm1, %v2716_v21, -inf  ;;  %v969_v20 = vmul.f32 0.2, %v961_v10 }
 0x85a   :  { %v1265_v24 = vpop.xlane.xlu0 %1264 }
 0x85b   :  { %2027 = vpow2.f32 %v1284_v56  ;;  %v1277_v63 = vsub.f32 %v1245_v34, %v1265_v24  ;;  %v977_v2 = vmax.f32 %v961_v10, %v969_v20 }
 0x85d   :  { %v2703_v14 = vpop.eup %2023  ;;  %v1290_v12 = vmul.f32 1.442695, %v1277_v63 }
 0x85e   :  { %v2705_v50 = vpop.eup %2025  ;;  %v1296_v41 = vsel %vm300_vm1, %v2703_v14, 0.0  ;;  %v1268_v59 = vpop.xlane.xlu2 %1267 }
 0x85f   :  { %1297 = vadd.xlane.f32.xlu2 %v1296_v41  ;;  %v1299_v51 = vsel %vm300_vm1, %v2705_v50, 0.0  ;;  %2029 = vpow2.f32 %v1290_v12  ;;  %v1278_v53 = vsub.f32 %v2676_v60, %v1268_v59  ;;  %v1008_v60 = vsel %vm300_vm1, %v2729_v9, -inf }
 0x860   :  { %1300 = vadd.xlane.f32.xlu0 %v1299_v51  ;;  %v2764_v41 = vadd.f32 %v2346_v57, %v977_v2 }
 0x861   :  { %v2711_v38 = vpop.eup %2027  ;;  %v1292_v29 = vmul.f32 1.442695, %v1278_v53 }
 0x862   :  { %v1302_v37 = vsel %vm300_vm1, %v2711_v38, 0.0  ;;  %v995_v43 = vpop.xlane.xlu0 %994  ;;  %v1005_v49 = vsel %vm300_vm1, %v2764_v41, -inf }
 0x863   :  { %1303 = vadd.xlane.f32.xlu1 %v1302_v37  ;;  %2031 = vpow2.f32 %v1292_v29 }
 0x865   :  { %v2721_v34 = vpop.eup %2029 }
 0x866   :  { %v1311_v26 = vsel %vm300_vm1, %v2721_v34, 0.0  ;;  %v1271_v37 = vpop.xlane.xlu2 %1270 }
 0x869   :  { %v2735_v18 = vpop.eup %2031 }
 0x86a   :  { %v998_v58 = vpop.xlane.xlu0 %997 }
 0x86b   :  { %1003 = vmax.xlane.f32.xlu1 %v1002_v3  ;;  %v1014_v52 = vsub.f32 %v982_v6, %v998_v58  ;;  %v959_v6 = vadd.f32 %v2637_v44, %v2651_v35  ;;  %v1013_v35 = vsub.f32 %v2684_v55, %v995_v43  ;;  %v1279_v3 = vsub.f32 %v2691_v22, %v1271_v37 }
 0x86d   :  { %v1025_v31 = vmul.f32 1.442695, %v1014_v52  ;;  %v967_v54 = vmul.f32 0.2, %v959_v6  ;;  %v1023_v17 = vmul.f32 1.442695, %v1013_v35 }
 0x86f   :  { %2033 = vpow2.f32 %v1025_v31  ;;  %v975_v5 = vmax.f32 %v959_v6, %v967_v54 }
 0x871   :  { %v2751_v11 = vadd.f32 %v2314_v25, %v975_v5 }
 0x873   :  { %1312 = vadd.xlane.f32.xlu1 %v1311_v26 }
 0x874   :  { %1340 = vrot.lane.b32.xlu0 %v2600_v0, %s2122_s1  ;;  %v1314_v0 = vsel %vm300_vm1, %v2735_v18, 0.0 }
 0x875   :  { %v2739_v46 = vpop.eup %2033 }
 0x876   :  { %v1044_v47 = vsel %vm300_vm1, %v2739_v46, 0.0 }
 0x877   :  { %1344 = vrot.lane.b32.xlu2 %v2608_v8, %s2122_s1  ;;  %v1259_v8 = vpop.xlane.xlu1 %1258 }
 0x878   :  { %v1275_v48 = vsub.f32 %v2668_v30, %v1259_v8  ;;  %v999_v30 = vsel %vm300_vm1, %v2751_v11, -inf }
 0x87a   :  { %v1286_v23 = vmul.f32 1.442695, %v1275_v48 }
 0x87b   :  { %1009 = vmax.xlane.f32.xlu1 %v1008_v60 }
 0x87c   :  { %2035 = vpow2.f32 %v1286_v23 }
 0x87d   :  { %2037 = vpow2.f32 %v1021_v27 }
 0x87e   :  { %2039 = vpow2.f32 %v1023_v17 }
 0x87f   :  { %v1262_v13 = vpop.xlane.xlu1 %1261 }
 0x880   :  { %v1276_v39 = vsub.f32 %v2681_v33, %v1262_v13  ;;  %v1011_v33 = vsub.f32 %v2642_v28, %v2657_v40  ;;  %v1294_v40 = vmul.f32 1.442695, %v1279_v3 }
 0x882   :  { %v2753_v56 = vpop.eup %2035  ;;  %v1288_v24 = vmul.f32 1.442695, %v1276_v39  ;;  %v1019_v63 = vmul.f32 1.442695, %v1011_v33 }
 0x883   :  { %1315 = vadd.xlane.f32.xlu1 %v1314_v0  ;;  %v1305_v44 = vsel %vm300_vm1, %v2753_v56, 0.0  ;;  %v2761_v42 = vpop.eup %2037 }
 0x884   :  { %v1038_v55 = vsel %vm300_vm1, %v2761_v42, 0.0  ;;  %2041 = vpow2.f32 %v1288_v24  ;;  %v2772_v51 = vpop.eup %2039 }
 0x885   :  { %v1041_v12 = vsel %vm300_vm1, %v2772_v51, 0.0  ;;  %2043 = vpow2.f32 %v1019_v63 }
 0x886   :  { %2045 = vpow2.f32 %v1294_v40 }
 0x887   :  { %v1343_v22 = vpop.permute.xlu1 %1342 }
 0x88a   :  { %v2774_v1 = vpop.eup %2041 }
 0x88b   :  { %1045 = vadd.xlane.f32.xlu1 %v1044_v47  ;;  %v1308_v28 = vsel %vm300_vm1, %v2774_v1, 0.0  ;;  %v2781_v62 = vpop.eup %2043 }
 0x88c   :  { %v1035_v43 = vsel %vm300_vm1, %v2781_v62, 0.0  ;;  %v2785_v59 = vpop.eup %2045 }
 0x88d   :  { %v1317_v4 = vsel %vm300_vm1, %v2785_v59, 0.0 }
 0x89e   :  { %1000 = vmax.xlane.f32.xlu0 %v999_v30 }
 0x8a0   :  { %1306 = vadd.xlane.f32.xlu2 %v1305_v44 }
 0x8a6   :  { %1039 = vadd.xlane.f32.xlu0 %v1038_v55 }
 0x8a8   :  { %1006 = vmax.xlane.f32.xlu2 %v1005_v49 }
 0x8ae   :  { %1042 = vadd.xlane.f32.xlu0 %v1041_v12 }
 0x8b0   :  { %1309 = vadd.xlane.f32.xlu2 %v1308_v28 }
 0x8b8   :  { %1036 = vadd.xlane.f32.xlu2 %v1035_v43 }
 0x8c0   :  { %1318 = vadd.xlane.f32.xlu2 %v1317_v4 }
 0x8d2   :  { %v1298_v53 = vpop.xlane.xlu2 %1297 }
 0x8d3   :  { %v1301_v7 = vpop.xlane.xlu0 %1300  ;;  %2047 = vrcp.f32 %v1298_v53 }
 0x8d4   :  { %2049 = vrcp.f32 %v1301_v7 }
 0x8d6   :  { %v1304_v26 = vpop.xlane.xlu1 %1303 }
 0x8d9   :  { %v2048_v60 = vpop.eup %2047 }
 0x8da   :  { %v1345_v29 = vpop.permute.xlu2 %1344  ;;  %v2050_v31 = vpop.eup %2049  ;;  %v1328_v47 = vmul.f32 %v2048_v60, %v2703_v14 }
 0x8db   :  { %1372 = vmatpush.bf16.msra.mxu3 %v1345_v29  ;;  %v1329_v8 = vmul.f32 %v2050_v31, %v2705_v50 }
 0x8dd   :  { %v1336_v48 = vpack.c.bf16 %v1329_v8, %v1328_v47 }
 0x8de   :  { %v1004_v58 = vpop.xlane.xlu1 %1003 }
 0x8df   :  { %v1016_v52 = vsub.f32 %v2716_v21, %v1004_v58  ;;  %1373 = vmatpush.bf16.msra.mxu3 %v1343_v22  ;;  %v2800_v21 = vld [vmem:[%s2944_s7] ss:$0 sm:$0xff] }
 0x8e1   :  { %v1029_v0 = vmul.f32 1.442695, %v1016_v52 }
 0x8e3   :  { %2051 = vpow2.f32 %v1029_v0 }
 0x8e4   :  { %2053 = vrcp.f32 %v1304_v26 }
 0x8e6   :  { %v1341_v6 = vpop.permute.xlu0 %1340  ;;  %v1313_v14 = vpop.xlane.xlu1 %1312 }
 0x8e7   :  { %1374 = vmatpush.bf16.msra.mxu3 %v1341_v6 }
 0x8e9   :  { %v2792_v54 = vpop.eup %2051 }
 0x8ea   :  { %1838 = vmatmul.msk.bf16.vlgmr.msra.gmra.mxu3 %vm300_vm1, %v1336_v48  ;;  %v1050_v23 = vsel %vm300_vm1, %v2792_v54, 0.0  ;;  %v2054_v20 = vpop.eup %2053 }
 0x8eb   :  { %1051 = vadd.xlane.f32.xlu0 %v1050_v23  ;;  %v1330_v44 = vmul.f32 %v2054_v20, %v2711_v38 }
 0x8ee   :  { %v1010_v50 = vpop.xlane.xlu1 %1009 }
 0x8ef   :  { %v1018_v27 = vsub.f32 %v2729_v9, %v1010_v50 }
 0x8f1   :  { %v1033_v35 = vmul.f32 1.442695, %v1018_v27 }
 0x8f6   :  { %v1316_v43 = vpop.xlane.xlu1 %1315 }
 0x8fe   :  { %v1046_v60 = vpop.xlane.xlu1 %1045 }
 0x8ff   :  { %1352 = vrot.lane.b32.xlu0 %v2800_v21, %s2122_s1 }
 0x911   :  { %v1001_v61 = vpop.xlane.xlu0 %1000 }
 0x912   :  { %v1015_v5 = vsub.f32 %v2751_v11, %v1001_v61 }
 0x913   :  { %v1307_v10 = vpop.xlane.xlu2 %1306 }
 0x914   :  { %v1027_v13 = vmul.f32 1.442695, %v1015_v5  ;;  %2055 = vrcp.f32 %v1307_v10 }
 0x916   :  { %2057 = vpow2.f32 %v1027_v13 }
 0x917   :  { %2059 = vpow2.f32 %v1033_v35 }
 0x91a   :  { %v2056_v30 = vpop.eup %2055 }
 0x91b   :  { %v1007_v39 = vpop.xlane.xlu2 %1006  ;;  %v1331_v2 = vmul.f32 %v2056_v30, %v2753_v56 }
 0x91c   :  { %v2808_v17 = vpop.eup %2057  ;;  %v1017_v24 = vsub.f32 %v2764_v41, %v1007_v39  ;;  %v1040_v41 = vpop.xlane.xlu0 %1039 }
 0x91d   :  { %v1047_v11 = vsel %vm300_vm1, %v2808_v17, 0.0  ;;  %v1337_v9 = vpack.c.bf16 %v1331_v2, %v1330_v44  ;;  %v2814_v33 = vpop.eup %2059 }
 0x91e   :  { %v1031_v55 = vmul.f32 1.442695, %v1017_v24  ;;  %1048 = vadd.xlane.f32.xlu2 %v1047_v11  ;;  %v1056_v56 = vsel %vm300_vm1, %v2814_v33, 0.0 }
 0x91f   :  { %1839 = vmatmul.msk.bf16.gmra.mxu3 %vm300_vm1, %v1337_v9 }
 0x920   :  { %2061 = vpow2.f32 %v1031_v55 }
 0x921   :  { %2063 = vrcp.f32 %v1313_v14 }
 0x923   :  { %v1310_v38 = vpop.xlane.xlu2 %1309 }
 0x924   :  { %2065 = vrcp.f32 %v1310_v38  ;;  %v1043_v58 = vpop.xlane.xlu0 %1042 }
 0x925   :  { %2067 = vrcp.f32 %v1040_v41  ;;  %v1862_v41 = vld [vmem:[%s2945_s8] sm:$0xff] }
 0x926   :  { %v2818_v49 = vpop.eup %2061  ;;  %1057 = vadd.xlane.f32.xlu2 %v1056_v56  ;;  %1469 = vmatpush.bf16.msra.mxu0 %v1862_v41 }
 0x927   :  { %v1053_v63 = vsel %vm300_vm1, %v2818_v49, 0.0  ;;  %v2064_v37 = vpop.eup %2063 }
 0x928   :  { %1054 = vadd.xlane.f32.xlu1 %v1053_v63  ;;  %v1333_v40 = vmul.f32 %v2064_v37, %v2721_v34 }
 0x92a   :  { %v2066_v12 = vpop.eup %2065 }
 0x92b   :  { %v1037_v3 = vpop.xlane.xlu2 %1036  ;;  %v1332_v28 = vmul.f32 %v2066_v12, %v2774_v1  ;;  %v2068_v22 = vpop.eup %2067 }
 0x92c   :  { %2069 = vrcp.f32 %v1037_v3  ;;  %v1068_v26 = vmul.f32 %v2068_v22, %v2761_v42 }
 0x92d   :  { %v1338_v4 = vpack.c.bf16 %v1333_v40, %v1332_v28  ;;  %2071 = vrcp.f32 %v1316_v43 }
 0x92f   :  { %1840 = vmatmul.msk.bf16.gmra.mxu3 %vm300_vm1, %v1338_v4 }
 0x932   :  { %v2070_v53 = vpop.eup %2069 }
 0x933   :  { %v1067_v7 = vmul.f32 %v2070_v53, %v2781_v62  ;;  %v1319_v29 = vpop.xlane.xlu2 %1318  ;;  %v2072_v34 = vpop.eup %2071 }
 0x934   :  { %2073 = vrcp.f32 %v1319_v29  ;;  %v1334_v31 = vmul.f32 %v2072_v34, %v2735_v18 }
 0x935   :  { %v1075_v52 = vpack.c.bf16 %v1068_v26, %v1067_v7  ;;  %2075 = vrcp.f32 %v1043_v58 }
 0x936   :  { %2077 = vrcp.f32 %v1046_v60 }
 0x937   :  { %1834 = vmatmul.msk.bf16.vlgmr.msrb.gmra.mxu2 %vm300_vm1, %v1075_v52 }
 0x93a   :  { %v2074_v1 = vpop.eup %2073 }
 0x93b   :  { %v1335_v0 = vmul.f32 %v2074_v1, %v2785_v59  ;;  %v2076_v8 = vpop.eup %2075 }
 0x93c   :  { %v2078_v42 = vpop.eup %2077  ;;  %v1069_v62 = vmul.f32 %v2076_v8, %v2772_v51 }
 0x93d   :  { %v1339_v47 = vpack.c.bf16 %v1335_v0, %v1334_v31  ;;  %v1070_v6 = vmul.f32 %v2078_v42, %v2739_v46 }
 0x93f   :  { %1841 = vmatmul.msk.bf16.gmra.mxu3 %vm300_vm1, %v1339_v47  ;;  %v1076_v48 = vpack.c.bf16 %v1070_v6, %v1069_v62 }
 0x947   :  { %1835 = vmatmul.msk.bf16.gmra.mxu2 %vm300_vm1, %v1076_v48 }
 0x95e   :  { %v1052_v23 = vpop.xlane.xlu0 %1051 }
 0x95f   :  { %2079 = vrcp.f32 %v1052_v23 }
 0x965   :  { %v2080_v27 = vpop.eup %2079 }
 0x966   :  { %v1072_v46 = vmul.f32 %v2080_v27, %v2792_v54 }
 0x96d   :  { %v1376_v14 = vpop.f32.mrf.mxu3 }
 0x971   :  { %v1353_v50 = vpop.permute.xlu0 %1352 }
 0x972   :  { %v1377_v5 = vadd.f32 %v1376_v14, %v1353_v50 }
 0x975   :  { %v1378_v61 = vpop.f32.mrf.mxu3 }
 0x976   :  { %v1379_v18 = vadd.f32 %v1378_v61, %v1353_v50 }
 0x978   :  { %v1935_v10 = vpack.i.bf16 %v1379_v18, %v1377_v5 }
 0x97a   :  { %1936 = vrot.lane.b32.xlu1 %v1935_v10, %s2123_s4 }
 0x991   :  { %v1049_v59 = vpop.xlane.xlu2 %1048 }
 0x992   :  { %2081 = vrcp.f32 %v1049_v59 }
 0x998   :  { %v2082_v13 = vpop.eup %2081 }
 0x999   :  { %v1071_v51 = vmul.f32 %v2082_v13, %v2808_v17  ;;  %v1058_v30 = vpop.xlane.xlu2 %1057 }
 0x99b   :  { %v1055_v20 = vpop.xlane.xlu1 %1054  ;;  %v1077_v35 = vpack.c.bf16 %v1072_v46, %v1071_v51 }
 0x99c   :  { %2083 = vrcp.f32 %v1055_v20 }
 0x99d   :  { %1836 = vmatmul.msk.bf16.gmra.mxu2 %vm300_vm1, %v1077_v35  ;;  %2085 = vrcp.f32 %v1058_v30 }
 0x9a2   :  { %v1381_v39 = vpop.f32.mrf.mxu3  ;;  %v2084_v44 = vpop.eup %2083 }
 0x9a3   :  { %v2086_v2 = vpop.eup %2085  ;;  %v1073_v24 = vmul.f32 %v2084_v44, %v2818_v49  ;;  %v1382_v55 = vadd.f32 %v1381_v39, %v1353_v50 }
 0x9a4   :  { %v1074_v11 = vmul.f32 %v2086_v2, %v2814_v33 }
 0x9a6   :  { %v1078_v17 = vpack.c.bf16 %v1074_v11, %v1073_v24 }
 0x9aa   :  { %v1383_v9 = vpop.f32.mrf.mxu3 }
 0x9ab   :  { %v1384_v38 = vadd.f32 %v1383_v9, %v1353_v50 }
 0x9ad   :  { %v1940_v56 = vpack.i.bf16 %v1384_v38, %v1382_v55  ;;  %1837 = vmatmul.msk.bf16.gmra.mxu2 %vm300_vm1, %v1078_v17 }
 0x9af   :  { %1941 = vrot.lane.b32.xlu2 %v1940_v56, %s2123_s4 }
 0x9b2   :  { %v1386_v54 = vpop.f32.mrf.mxu3 }
 0x9b3   :  { %v1387_v37 = vadd.f32 %v1386_v54, %v1353_v50 }
 0x9ba   :  { %v1388_v63 = vpop.f32.mrf.mxu3  ;;  %v1107_v4 = vpop.f32.mrf.mxu2 }
 0x9bb   :  { %v1389_v49 = vadd.f32 %v1388_v63, %v1353_v50  ;;  %v1108_v26 = vadd.f32 %v2800_v21, %v1107_v4 }
 0x9bd   :  { %v1945_v12 = vpack.i.bf16 %v1389_v49, %v1387_v37 }
 0x9bf   :  { %1946 = vrot.lane.b32.xlu0 %v1945_v12, %s2123_s4 }
 0x9c2   :  { %v1391_v33 = vpop.f32.mrf.mxu3  ;;  %v1109_v22 = vpop.f32.mrf.mxu2 }
 0x9c3   :  { %v1392_v28 = vadd.f32 %v1391_v33, %v1353_v50  ;;  %v1110_v7 = vadd.f32 %v2800_v21, %v1109_v22 }
 0x9ca   :  { %v1393_v3 = vpop.f32.mrf.mxu3  ;;  %v1112_v1 = vpop.f32.mrf.mxu2 }
 0x9cb   :  { %v1394_v40 = vadd.f32 %v1393_v3, %v1353_v50  ;;  %v1113_v47 = vadd.f32 %v2800_v21, %v1112_v1  ;;  %v1438_v50 = vld [vmem:[%s2946_s9] sm:$0x3] }
 0x9cc   :  { %v1510_v61 = vsel %vm1508_vm3, %v1438_v50, 0 }
 0x9cd   :  { %v1950_v43 = vpack.i.bf16 %v1394_v40, %v1392_v28  ;;  %1519 = vmatpush.bf16.msra.mxu1 %v1510_v61 }
 0x9cf   :  { %1951 = vrot.lane.b32.xlu0 %v1950_v43, %s2123_s4 }
 0x9d2   :  { %v1114_v31 = vpop.f32.mrf.mxu2 }
 0x9d3   :  { %v1115_v8 = vadd.f32 %v2800_v21, %v1114_v31 }
 0x9ec   :  { %v1937_v53 = vpop.permute.xlu1 %1936 }
 0x9ed   :  { %v1939_v29 = vunpack.i.h.bf16 %v1937_v53  ;;  %v1938_v58 = vunpack.i.l.bf16 %v1937_v53 }
 0x9ef   :  { %v1429_v52 = vsel %vm742_vm2, %v1110_v7, %v1939_v29  ;;  %v1428_v60 = vsel %vm742_vm2, %v1108_v26, %v1938_v58 }
 0x9f0   :  { %v1440_v34 = vpack.c.bf16 %v1429_v52, %v1428_v60 }
 0x9f2   :  { %1846 = vmatmul.msk.bf16.vlgmr.msra.gmra.mxu0 %vm78_vm0, %v1440_v34 }
 0xa09   :  { %v1942_v0 = vpop.permute.xlu2 %1941 }
 0xa0a   :  { %v1944_v42 = vunpack.i.h.bf16 %v1942_v0  ;;  %v1943_v62 = vunpack.i.l.bf16 %v1942_v0 }
 0xa0c   :  { %v1430_v6 = vsel %vm742_vm2, %v1113_v47, %v1943_v62  ;;  %v1431_v48 = vsel %vm742_vm2, %v1115_v8, %v1944_v42 }
 0xa0d   :  { %v1441_v23 = vpack.c.bf16 %v1431_v48, %v1430_v6 }
 0xa0f   :  { %1847 = vmatmul.msk.bf16.gmra.mxu0 %vm78_vm0, %v1441_v23 }
 0xa20   :  { %v1117_v14 = vpop.f32.mrf.mxu2 }
 0xa21   :  { %v1118_v10 = vadd.f32 %v2800_v21, %v1117_v14 }
 0xa28   :  { %v1119_v5 = vpop.f32.mrf.mxu2 }
 0xa29   :  { %v1120_v59 = vadd.f32 %v2800_v21, %v1119_v5 }
 0xa30   :  { %v1122_v20 = vpop.f32.mrf.mxu2 }
 0xa31   :  { %v1947_v18 = vpop.permute.xlu0 %1946  ;;  %v1123_v44 = vadd.f32 %v2800_v21, %v1122_v20 }
 0xa32   :  { %v1949_v27 = vunpack.i.h.bf16 %v1947_v18  ;;  %v1948_v13 = vunpack.i.l.bf16 %v1947_v18 }
 0xa34   :  { %v1432_v51 = vsel %vm742_vm2, %v1118_v10, %v1948_v13  ;;  %v1433_v46 = vsel %vm742_vm2, %v1120_v59, %v1949_v27 }
 0xa35   :  { %v1442_v35 = vpack.c.bf16 %v1433_v46, %v1432_v51 }
 0xa37   :  { %1848 = vmatmul.msk.bf16.gmra.mxu0 %vm78_vm0, %v1442_v35 }
 0xa38   :  { %v1124_v30 = vpop.f32.mrf.mxu2 }
 0xa39   :  { %v1125_v2 = vadd.f32 %v2800_v21, %v1124_v30 }
 0xa41   :  { %v1952_v39 = vpop.permute.xlu0 %1951 }
 0xa42   :  { %v1954_v24 = vunpack.i.h.bf16 %v1952_v39  ;;  %v1953_v11 = vunpack.i.l.bf16 %v1952_v39 }
 0xa44   :  { %v1434_v9 = vsel %vm742_vm2, %v1123_v44, %v1953_v11  ;;  %v1435_v55 = vsel %vm742_vm2, %v1125_v2, %v1954_v24 }
 0xa45   :  { %v1443_v38 = vpack.c.bf16 %v1435_v55, %v1434_v9 }
 0xa47   :  { %1849 = vmatmul.msk.bf16.gmra.mxu0 %vm78_vm0, %v1443_v38 }
 0xa6f   :  { %v1471_v17 = vpop.f32.mrf.mxu0 }
 0xa77   :  { %v1473_v56 = vpop.f32.mrf.mxu0 }
 0xa78   :  { %v1491_v54 = vpack.c.bf16 %v1473_v56, %v1471_v17 }
 0xa7a   :  { %1850 = vmatmul.msk.bf16.vlgmr.msra.gmra.mxu1 %vm1495_vm4, %v1491_v54 }
 0xa8c   :  { %v1476_v41 = vpop.f32.mrf.mxu0 }
 0xa94   :  { %v1478_v63 = vpop.f32.mrf.mxu0 }
 0xa95   :  { %v1492_v37 = vpack.c.bf16 %v1478_v63, %v1476_v41 }
 0xa97   :  { %1851 = vmatmul.msk.bf16.gmra.mxu1 %vm1495_vm4, %v1492_v37 }
 0xab4   :  { %v1481_v21 = vpop.f32.mrf.mxu0 }
 0xabc   :  { %v1483_v49 = vpop.f32.mrf.mxu0 }
 0xabd   :  { %v1493_v12 = vpack.c.bf16 %v1483_v49, %v1481_v21 }
 0xabf   :  { %1852 = vmatmul.msk.bf16.gmra.mxu1 %vm1495_vm4, %v1493_v12 }
 0xac4   :  { %v1486_v33 = vpop.f32.mrf.mxu0 }
 0xacc   :  { %v1488_v3 = vpop.f32.mrf.mxu0 }
 0xacd   :  { %v1494_v28 = vpack.c.bf16 %v1488_v3, %v1486_v33 }
 0xacf   :  { %1853 = vmatmul.msk.bf16.gmra.mxu1 %vm1495_vm4, %v1494_v28  ;;  %1757 = vmatpush.bf16.msra.mxu2 %v1494_v28 }
 0xad3   :  { %1758 = vmatpush.bf16.msra.mxu2 %v1493_v12 }
 0xad7   :  { %1759 = vmatpush.bf16.msra.mxu2 %v1492_v37 }
 0xadb   :  { %1760 = vmatpush.bf16.msra.mxu2 %v1491_v54 }
 0xaf7   :  { %v1521_v40 = vpop.f32.mrf.mxu1 }
 0xaf8   :  { %1575 = vperm.xlu2 %1933, %v1521_v40  }
 0xaff   :  { %v1523_v43 = vpop.f32.mrf.mxu1 }
 0xb00   :  { %1580 = vperm.xlu1 %1934, %v1523_v43  }
 0xb14   :  { %v1526_v4 = vpop.f32.mrf.mxu1 }
 0xb15   :  { %1585 = vperm.xlu0 %1955, %v1526_v4  }
 0xb1c   :  { %v1528_v22 = vpop.f32.mrf.mxu1 }
 0xb1d   :  { %1590 = vperm.xlu2 %1933, %v1528_v22  }
 0xb35   :  { %1541 = vxpose.xlu1.b32.start [1/8] (short) (narrow) %v1521_v40, 8 }
 0xb3c   :  { %v1531_v53 = vpop.f32.mrf.mxu1 }
 0xb3d   :  { %1542 = vxpose.xlu1.b32.cont [2/8] (short) (narrow) %v1523_v43, 8  ;;  %1595 = vperm.xlu0 %1955, %v1531_v53  }
 0xb44   :  { %v1533_v26 = vpop.f32.mrf.mxu1 }
 0xb45   :  { %1543 = vxpose.xlu1.b32.cont [3/8] (short) (narrow) %v1526_v4, 8  ;;  %1600 = vperm.xlu2 %1933, %v1533_v26  }
 0xb4c   :  { %v1536_v7 = vpop.f32.mrf.mxu1 }
 0xb4d   :  { %1544 = vxpose.xlu1.b32.cont [4/8] (short) (narrow) %v1528_v22, 8  ;;  %1605 = vperm.xlu0 %1955, %v1536_v7  }
 0xb52   :  { %v1576_v52 = vpop.permute.xlu2 %1575 }
 0xb54   :  { %v1538_v29 = vpop.f32.mrf.mxu1 }
 0xb55   :  { %1545 = vxpose.xlu1.b32.cont [5/8] (short) (narrow) %v1531_v53, 8  ;;  %1610 = vperm.xlu2 %1933, %v1538_v29  }
 0xb5d   :  { %1546 = vxpose.xlu1.b32.cont [6/8] (short) (narrow) %v1533_v26, 8 }
 0xb65   :  { %1547 = vxpose.xlu1.b32.cont [7/8] (short) (narrow) %v1536_v7, 8 }
 0xb6d   :  { %1548 = vxpose.xlu1.b32.end [8/8] (short) (narrow) %v1538_v29, 8 }
 0xb72   :  { %v1581_v58 = vpop.permute.xlu1 %1580 }
 0xb77   :  { %v1591_v34 = vpop.permute.xlu2 %1590 }
 0xb87   :  { %v1586_v1 = vpop.permute.xlu0 %1585 }
 0xb9f   :  { %v1601_v61 = vpop.permute.xlu2 %1600 }
 0xbaf   :  { %v1596_v5 = vpop.permute.xlu0 %1595  ;;  %v1611_v2 = vpop.permute.xlu2 %1610 }
 0xbd9   :  { %v1557_v60 = vpop.trf.xlu1 }
 0xbda   :  { %v1613_v31 = vperm.slane %v1557_v60, 0 }
 0xbdc   :  { %v1615_v0 = vadd.f32 %v1613_v31, %v1581_v58  ;;  %v1614_v47 = vadd.f32 %v1613_v31, %v1576_v52  ;;  %v1616_v8 = vadd.f32 %v1613_v31, %v1586_v1  ;;  %v1617_v42 = vadd.f32 %v1613_v31, %v1591_v34 }
 0xbdd   :  { %v1618_v59 = vadd.f32 %v1613_v31, %v1596_v5  ;;  %v1619_v27 = vadd.f32 %v1613_v31, %v1601_v61 }
 0xbde   :  { %v1623_v62 = vmul.f32 0.2, %v1615_v0  ;;  %v1622_v6 = vmul.f32 0.2, %v1614_v47  ;;  %v1624_v14 = vmul.f32 0.2, %v1616_v8 }
 0xbdf   :  { %v1625_v50 = vmul.f32 0.2, %v1617_v42  ;;  %v1626_v39 = vmul.f32 0.2, %v1618_v59  ;;  %v1627_v44 = vmul.f32 0.2, %v1619_v27 }
 0xbe0   :  { %v1631_v48 = vmax.f32 %v1615_v0, %v1623_v62  ;;  %v1630_v23 = vmax.f32 %v1614_v47, %v1622_v6  ;;  %v1632_v46 = vmax.f32 %v1616_v8, %v1624_v14 }
 0xbe1   :  { %v1633_v20 = vmax.f32 %v1617_v42, %v1625_v50  ;;  %v1634_v55 = vmax.f32 %v1618_v59, %v1626_v39  ;;  %v1635_v38 = vmax.f32 %v1619_v27, %v1627_v44 }
 0xbe2   :  { %v1639_v18 = vadd.f32 %v2397_v32, %v1631_v48  ;;  %v1638_v10 = vadd.f32 %v2336_v45, %v1630_v23  ;;  %v1640_v35 = vadd.f32 %v2312_v19, %v1632_v46  ;;  %v1606_v32 = vpop.permute.xlu0 %1605  ;;  %v1621_v45 = vadd.f32 %v1613_v31, %v1611_v2 }
 0xbe3   :  { %v1641_v30 = vadd.f32 %v2310_v16, %v1633_v20  ;;  %v1620_v24 = vadd.f32 %v1613_v31, %v1606_v32  ;;  %v1642_v17 = vadd.f32 %v2314_v25, %v1634_v55  ;;  %v1643_v19 = vadd.f32 %v2324_v36, %v1635_v38 }
 0xbe4   :  { %v1649_v13 = vsel %vm300_vm1, %v1639_v18, -inf  ;;  %v1646_v51 = vsel %vm300_vm1, %v1638_v10, -inf  ;;  %v1652_v11 = vsel %vm300_vm1, %v1640_v35, -inf  ;;  %v1629_v16 = vmul.f32 0.2, %v1621_v45 }
 0xbe5   :  { %1650 = vmax.xlane.f32.xlu2 %v1649_v13  ;;  %1647 = vmax.xlane.f32.xlu0 %v1646_v51  ;;  %v1655_v9 = vsel %vm300_vm1, %v1641_v30, -inf  ;;  %v1628_v56 = vmul.f32 0.2, %v1620_v24  ;;  %v1658_v54 = vsel %vm300_vm1, %v1642_v17, -inf  ;;  %v1661_v41 = vsel %vm300_vm1, %v1643_v19, -inf }
 0xbe6   :  { %v1637_v37 = vmax.f32 %v1621_v45, %v1629_v16 }
 0xbe7   :  { %v1636_v63 = vmax.f32 %v1620_v24, %v1628_v56 }
 0xbe8   :  { %v1645_v49 = vadd.f32 %v2361_v15, %v1637_v37 }
 0xbe9   :  { %v1644_v21 = vadd.f32 %v2346_v57, %v1636_v63 }
 0xbea   :  { %v1667_v25 = vsel %vm300_vm1, %v1645_v49, -inf }
 0xbeb   :  { %v1664_v12 = vsel %vm300_vm1, %v1644_v21, -inf }
 0xbed   :  { %1653 = vmax.xlane.f32.xlu2 %v1652_v11  ;;  %1656 = vmax.xlane.f32.xlu0 %v1655_v9 }
 0xbf5   :  { %1659 = vmax.xlane.f32.xlu2 %v1658_v54  ;;  %1662 = vmax.xlane.f32.xlu0 %v1661_v41 }
 0xbfd   :  { %1665 = vmax.xlane.f32.xlu2 %v1664_v12  ;;  %1668 = vmax.xlane.f32.xlu0 %v1667_v25 }
 0xc58   :  { %v1651_v36 = vpop.xlane.xlu2 %1650  ;;  %v1648_v33 = vpop.xlane.xlu0 %1647 }
 0xc59   :  { %v1671_v3 = vsub.f32 %v1639_v18, %v1651_v36  ;;  %v1670_v28 = vsub.f32 %v1638_v10, %v1648_v33 }
 0xc5b   :  { %v1680_v40 = vmul.f32 1.442695, %v1671_v3  ;;  %v1678_v43 = vmul.f32 1.442695, %v1670_v28 }
 0xc5d   :  { %2087 = vpow2.f32 %v1680_v40  ;;  %v1958_v40 = vld [vmem:[%s2947_s10] ss:$0 sm:$0xff] }
 0xc5e   :  { %2089 = vpow2.f32 %v1678_v43 }
 0xc60   :  { %v1654_v4 = vpop.xlane.xlu2 %1653  ;;  %v1657_v22 = vpop.xlane.xlu0 %1656 }
 0xc61   :  { %v1672_v53 = vsub.f32 %v1640_v35, %v1654_v4  ;;  %v1673_v57 = vsub.f32 %v1641_v30, %v1657_v22 }
 0xc63   :  { %v2088_v26 = vpop.eup %2087  ;;  %v1682_v15 = vmul.f32 1.442695, %v1672_v53  ;;  %v1684_v7 = vmul.f32 1.442695, %v1673_v57 }
 0xc64   :  { %v2090_v29 = vpop.eup %2089  ;;  %v1697_v58 = vsel %vm300_vm1, %v2088_v26, 0.0 }
 0xc65   :  { %2091 = vpow2.f32 %v1682_v15  ;;  %1698 = vadd.xlane.f32.xlu0 %v1697_v58  ;;  %v1694_v52 = vsel %vm300_vm1, %v2090_v29, 0.0 }
 0xc66   :  { %2093 = vpow2.f32 %v1684_v7  ;;  %1695 = vadd.xlane.f32.xlu2 %v1694_v52 }
 0xc68   :  { %v1660_v60 = vpop.xlane.xlu2 %1659  ;;  %v1663_v34 = vpop.xlane.xlu0 %1662 }
 0xc69   :  { %v1674_v1 = vsub.f32 %v1642_v17, %v1660_v60  ;;  %v1675_v31 = vsub.f32 %v1643_v19, %v1663_v34 }
 0xc6b   :  { %v2092_v0 = vpop.eup %2091  ;;  %v1686_v47 = vmul.f32 1.442695, %v1674_v1  ;;  %v1688_v8 = vmul.f32 1.442695, %v1675_v31 }
 0xc6c   :  { %v2094_v42 = vpop.eup %2093  ;;  %v1700_v62 = vsel %vm300_vm1, %v2092_v0, 0.0 }
 0xc6d   :  { %2095 = vpow2.f32 %v1686_v47  ;;  %v1703_v6 = vsel %vm300_vm1, %v2094_v42, 0.0 }
 0xc6e   :  { %2097 = vpow2.f32 %v1688_v8  ;;  %1701 = vadd.xlane.f32.xlu2 %v1700_v62  ;;  %1704 = vadd.xlane.f32.xlu0 %v1703_v6 }
 0xc70   :  { %v1666_v48 = vpop.xlane.xlu2 %1665  ;;  %v1669_v23 = vpop.xlane.xlu0 %1668 }
 0xc71   :  { %v1676_v14 = vsub.f32 %v1644_v21, %v1666_v48  ;;  %v1677_v50 = vsub.f32 %v1645_v49, %v1669_v23 }
 0xc73   :  { %v2096_v61 = vpop.eup %2095  ;;  %v1690_v5 = vmul.f32 1.442695, %v1676_v14  ;;  %v1692_v18 = vmul.f32 1.442695, %v1677_v50 }
 0xc74   :  { %v2098_v10 = vpop.eup %2097  ;;  %v1706_v59 = vsel %vm300_vm1, %v2096_v61, 0.0 }
 0xc75   :  { %2099 = vpow2.f32 %v1690_v5  ;;  %v1709_v27 = vsel %vm300_vm1, %v2098_v10, 0.0 }
 0xc76   :  { %2101 = vpow2.f32 %v1692_v18  ;;  %1707 = vadd.xlane.f32.xlu2 %v1706_v59  ;;  %1710 = vadd.xlane.f32.xlu0 %v1709_v27 }
 0xc7b   :  { %v2100_v13 = vpop.eup %2099 }
 0xc7c   :  { %v2102_v51 = vpop.eup %2101  ;;  %v1712_v46 = vsel %vm300_vm1, %v2100_v13, 0.0 }
 0xc7d   :  { %1713 = vadd.xlane.f32.xlu1 %v1712_v46  ;;  %v1715_v20 = vsel %vm300_vm1, %v2102_v51, 0.0 }
 0xc7e   :  { %1716 = vadd.xlane.f32.xlu2 %v1715_v20 }
 0xcd8   :  { %v1699_v35 = vpop.xlane.xlu0 %1698 }
 0xcd9   :  { %v1696_v30 = vpop.xlane.xlu2 %1695  ;;  %2103 = vrcp.f32 %v1699_v35 }
 0xcda   :  { %2105 = vrcp.f32 %v1696_v30 }
 0xcdf   :  { %v2104_v39 = vpop.eup %2103 }
 0xce0   :  { %v2106_v44 = vpop.eup %2105  ;;  %v1727_v2 = vmul.f32 %v2104_v39, %v2088_v26 }
 0xce1   :  { %v1726_v32 = vmul.f32 %v2106_v44, %v2090_v29  ;;  %v1702_v24 = vpop.xlane.xlu2 %1701  ;;  %v1705_v11 = vpop.xlane.xlu0 %1704 }
 0xce2   :  { %2107 = vrcp.f32 %v1702_v24 }
 0xce3   :  { %v1734_v45 = vpack.c.bf16 %v1727_v2, %v1726_v32  ;;  %2109 = vrcp.f32 %v1705_v11 }
 0xce5   :  { %1854 = vmatmul.msk.bf16.vlgmr.msra.gmra.mxu2 %vm300_vm1, %v1734_v45 }
 0xce8   :  { %v2108_v9 = vpop.eup %2107 }
 0xce9   :  { %v2110_v55 = vpop.eup %2109  ;;  %v1728_v38 = vmul.f32 %v2108_v9, %v2092_v0  ;;  %v1708_v19 = vpop.xlane.xlu2 %1707 }
 0xcea   :  { %v1729_v17 = vmul.f32 %v2110_v55, %v2094_v42  ;;  %v1711_v56 = vpop.xlane.xlu0 %1710  ;;  %2111 = vrcp.f32 %v1708_v19 }
 0xceb   :  { %2113 = vrcp.f32 %v1711_v56 }
 0xcec   :  { %v1735_v16 = vpack.c.bf16 %v1729_v17, %v1728_v38 }
 0xcf0   :  { %v2112_v54 = vpop.eup %2111  ;;  %v1714_v21 = vpop.xlane.xlu1 %1713 }
 0xcf1   :  { %v2114_v41 = vpop.eup %2113  ;;  %v1730_v63 = vmul.f32 %v2112_v54, %v2096_v61  ;;  %v1717_v49 = vpop.xlane.xlu2 %1716  ;;  %2115 = vrcp.f32 %v1714_v21 }
 0xcf2   :  { %v1731_v37 = vmul.f32 %v2114_v41, %v2098_v10  ;;  %2117 = vrcp.f32 %v1717_v49 }
 0xcf4   :  { %v1736_v12 = vpack.c.bf16 %v1731_v37, %v1730_v63 }
 0xcf5   :  { %1855 = vmatmul.msk.bf16.gmra.mxu2 %vm300_vm1, %v1735_v16 }
 0xcf7   :  { %v2116_v25 = vpop.eup %2115 }
 0xcf8   :  { %v2118_v36 = vpop.eup %2117  ;;  %v1732_v33 = vmul.f32 %v2116_v25, %v2100_v13 }
 0xcf9   :  { %v1733_v3 = vmul.f32 %v2118_v36, %v2102_v51 }
 0xcfb   :  { %v1737_v28 = vpack.c.bf16 %v1733_v3, %v1732_v33 }
 0xd05   :  { %1856 = vmatmul.msk.bf16.gmra.mxu2 %vm300_vm1, %v1736_v12 }
 0xd15   :  { %1857 = vmatmul.msk.bf16.gmra.mxu2 %vm300_vm1, %v1737_v28 }
 0xd68   :  { %v1762_v43 = vpop.f32.mrf.mxu2 }
 0xd69   :  { %v1763_v4 = vadd.f32 %v1958_v40, %v1762_v43 }
 0xd6b   :  { %1782 = vst.msk [vmem:[%s2948_s11] sm:$0xff] %vm1495_vm4, %v1763_v4 }
 0xd70   :  { %v1764_v22 = vpop.f32.mrf.mxu2 }
 0xd71   :  { %v1765_v53 = vadd.f32 %v1958_v40, %v1764_v22 }
 0xd73   :  { %1783 = vst.msk [vmem:[%s2948_s11 + $0x8] sm:$0xff] %vm1495_vm4, %v1765_v53 }
 0xd78   :  { %v1767_v57 = vpop.f32.mrf.mxu2 }
 0xd79   :  { %v1768_v26 = vadd.f32 %v1958_v40, %v1767_v57 }
 0xd7b   :  { %1784 = vst.msk [vmem:[%s2948_s11 + $0x10] sm:$0xff] %vm1495_vm4, %v1768_v26 }
 0xd80   :  { %v1769_v15 = vpop.f32.mrf.mxu2 }
 0xd81   :  { %v1770_v7 = vadd.f32 %v1958_v40, %v1769_v15 }
 0xd83   :  { %1785 = vst.msk [vmem:[%s2948_s11 + $0x18] sm:$0xff] %vm1495_vm4, %v1770_v7 }
 0xd88   :  { %v1772_v29 = vpop.f32.mrf.mxu2 }
 0xd89   :  { %v1773_v58 = vadd.f32 %v1958_v40, %v1772_v29 }
 0xd8b   :  { %1786 = vst.msk [vmem:[%s2948_s11 + $0x20] sm:$0xff] %vm1495_vm4, %v1773_v58 }
 0xd90   :  { %v1774_v52 = vpop.f32.mrf.mxu2 }
 0xd91   :  { %v1775_v60 = vadd.f32 %v1958_v40, %v1774_v52 }
 0xd93   :  { %1787 = vst.msk [vmem:[%s2948_s11 + $0x28] sm:$0xff] %vm1495_vm4, %v1775_v60 }
 0xd98   :  { %v1777_v34 = vpop.f32.mrf.mxu2 }
 0xd99   :  { %v1778_v1 = vadd.f32 %v1958_v40, %v1777_v34 }
 0xd9b   :  { %1788 = vst.msk [vmem:[%s2948_s11 + $0x30] sm:$0xff] %vm1495_vm4, %v1778_v1 }
 0xda0   :  { %v1779_v31 = vpop.f32.mrf.mxu2 }
 0xda1   :  { %v1780_v0 = vadd.f32 %v1958_v40, %v1779_v31 }
 0xda3   :  { %1789 = vst.msk [vmem:[%s2948_s11 + $0x38] sm:$0xff] %vm1495_vm4, %v1780_v0 }

</bundles_post_ra>
